<compile_context>
chip_gen: v6e
topology: v6e:2x2x1
jax: 0.10.0
libtpu: 0.0.40
codegen_flags: <defaults>
</compile_context>

<pallas_src>
import jax
import jax.numpy as jnp
from jax import lax
from jax.experimental import pallas as pl
from jax.experimental.pallas import tpu as pltpu


# --------------------------------------------------------------------------
# Fused kernel. Recurrence rows are time-major: row index = t*B + b.
# --------------------------------------------------------------------------
def _make_net_kernel(num_layers, D):
    def kernel(keep2_ref, mask_tb_ref, perm_ref, x_ref, *refs):
        lstm_refs = refs[:3 * num_layers]
        w1_ref, b1_ref, w2_ref, w3_ref, b3_ref = refs[3 * num_layers:3 * num_layers + 5]
        logp_ref, weight_ref, pen_ref = refs[3 * num_layers + 5:3 * num_layers + 8]
        seq_scr, out_scr = refs[3 * num_layers + 8:]

        T, B = mask_tb_ref.shape
        DH = keep2_ref.shape[1]          # D * hidden_dim
        H = DH // D
        SIG = 3 * DH                     # width of the sigmoid slab [i | f | o]

        # ---------------- stacked (bi)directional LSTM recurrence ----------------
        for l in range(num_layers):
            wih = lstm_refs[3 * l][...]          # (K_l, 4*DH)  block per direction
            whh = lstm_refs[3 * l + 1][...]      # (DH, 4*DH)   block-diagonal
            bias = lstm_refs[3 * l + 2][...]     # (1, 4*DH)    b_ih + b_hh, fused order

            inp = x_ref[...] if l == 0 else seq_scr[...]
            # Hoisted input projection: all timesteps & both directions, ONE matmul.
            xp = jnp.dot(inp, wih, preferred_element_type=jnp.float32) + bias  # (T*B, 4*DH)

            h = jnp.zeros((B, DH), jnp.float32)
            c = jnp.zeros((B, DH), jnp.float32)
            last = (l == num_layers - 1)

            for s in range(T):                   # statically unrolled; T is small & known
                tb = T - 1 - s                   # backward direction walks time in reverse
                pre = jnp.dot(h, whh, preferred_element_type=jnp.float32) \
                    + xp[s * B:(s + 1) * B, :]                       # (B, 4*DH)
                keep = keep2_ref[s * B:(s + 1) * B, :] > 0.0         # (B, DH) freeze mask

                sig = jax.nn.sigmoid(pre[:, :SIG])   # ONE wide sigmoid: [i | f | o]
                g = jnp.tanh(pre[:, SIG:])           # ONE wide tanh:    [g]
                c_new = sig[:, DH:2 * DH] * c + sig[:, :DH] * g
                h_new = sig[:, 2 * DH:SIG] * jnp.tanh(c_new)

                # pack_padded_sequence semantics: freeze state at t >= length[b]
                c = jnp.where(keep, c_new, c)
                h = jnp.where(keep, h_new, h)

                if last:
                    # time-aligned rows for the attention head
                    out_scr[s * B:(s + 1) * B, 0:H] = h[:, 0:H]
                    if D == 2:
                        out_scr[tb * B:(tb + 1) * B, H:DH] = h[:, H:DH]
                else:
                    # step-aligned rows: exactly the layout the next layer's fused
                    # input projection expects (bwd half already time-reversed)
                    seq_scr[s * B:(s + 1) * B, :] = h

        # ------------------- attention + classifier + penalty -------------------
        Hb = DH
        out_all = out_scr[...]                                           # (T*B, Hb)
        h1 = jnp.tanh(jnp.dot(out_all, w1_ref[...],
                              preferred_element_type=jnp.float32) + b1_ref[...])  # (T*B, da)
        pot = jnp.dot(h1, w2_ref[...], preferred_element_type=jnp.float32)         # (T*B, r)
        r = pot.shape[1]

        # batch-major re-layout via ONE constant 0/1 selector matmul on the idle MXU
        P = perm_ref[...]                                                 # (B*T, T*B)
        ob_all = jnp.dot(P, out_all, preferred_element_type=jnp.float32)  # (B*T, Hb)
        pot_all = jnp.dot(P, pot, preferred_element_type=jnp.float32)     # (B*T, r)

        mask_tb = mask_tb_ref[...]
        w3 = w3_ref[...]
        b3 = b3_ref[...]

        logit_rows = []
        pen = jnp.zeros((1, 1), jnp.float32)
        for b in range(B):                       # B tiny; per-b slices are tile-aligned
            ob = ob_all[b * T:(b + 1) * T, :]                             # (T, Hb)
            potb = pot_all[b * T:(b + 1) * T, :]                          # (T, r)
            validb = mask_tb[:, b:b + 1] > 0.0                            # (T, 1)

            neg = jnp.where(validb, potb, -1e30)
            m = jnp.max(neg, axis=0, keepdims=True)                       # (1, r)
            e = jnp.exp(neg - m)
            ssum = jnp.sum(e, axis=0, keepdims=True)
            wb = jnp.where(validb, e * pl.reciprocal(ssum, approx=True), 0.0)  # (T, r)

            wT = jnp.transpose(wb)                                        # (r, T)
            weight_ref[b] = wT

            ofb = jnp.dot(wT, ob, preferred_element_type=jnp.float32)     # (r, Hb)
            # flatten (r, Hb) -> (1, r*Hb); r is tiny so the per-row concat is cheap.
            # TODO(synk): a both-dims dot_general vs a (r, Hb, O) weight would drop
            # this relayout but is not a supported Mosaic matmul form.
            ofc = jnp.concatenate([ofb[j:j + 1, :] for j in range(r)], axis=1)  # (1, r*Hb)
            logit_rows.append(jnp.dot(ofc, w3, preferred_element_type=jnp.float32) + b3)

            sq = jnp.sqrt(wT)        # module penalty: ||sqrt(A) sqrt(A)^T - ones||^2
            gram = lax.dot_general(sq, sq, (((1,), (1,)), ((), ())),
                                   preferred_element_type=jnp.float32)    # (r, r)
            pen = pen + jnp.sum((gram - 1.0) ** 2, keepdims=True)

        logits = jnp.concatenate(logit_rows, axis=0)                      # (B, O)
        mx = jnp.max(logits, axis=1, keepdims=True)
        lse = mx + jnp.log(jnp.sum(jnp.exp(logits - mx), axis=1, keepdims=True))
        logp_ref[...] = logits - lse                                      # LogSoftmax(dim=1)
        pen_ref[...] = pen

    return kernel


def _full_spec(shape):
    nd = len(shape)
    return pl.BlockSpec(shape, lambda i, _nd=nd: (0,) * _nd)


# --------------------------------------------------------------------------
# Parameter construction (fused / transposed layouts the kernel consumes).
# Gate column order is gate-major, direction-minor: [i_f i_b | f_f f_b | o_f o_b | g_f g_b]
# (random init, so only internal consistency matters; loading torch weights would
# require reordering from torch's [i, f, g, o]).
# --------------------------------------------------------------------------
def init_params(key, input_dim, hidden_dim, output_dim, num_layers, biFlag, da, r):
    D = 2 if biFlag else 1
    H = hidden_dim
    G = 4 * H
    nk = num_layers * D * 4 + 5
    keys = iter(jax.random.split(key, nk))

    def unif(shape, bound):
        return jax.random.uniform(next(keys), shape, jnp.float32, -bound, bound)

    kH = 1.0 / (H ** 0.5)

    def pack_cols(per_dir, rows_per_dir):
        # per_dir[d]: (rows_per_dir, 4H) with per-direction gate order [i|f|o|g]
        out = jnp.zeros((D * rows_per_dir, D * G), jnp.float32)
        for d in range(D):
            for q in range(4):
                out = out.at[d * rows_per_dir:(d + 1) * rows_per_dir,
                             q * D * H + d * H: q * D * H + (d + 1) * H].set(
                                 per_dir[d][:, q * H:(q + 1) * H])
        return out

    def pack_bias(per_dir):
        out = jnp.zeros((1, D * G), jnp.float32)
        for d in range(D):
            for q in range(4):
                out = out.at[:, q * D * H + d * H: q * D * H + (d + 1) * H].set(
                    per_dir[d][:, q * H:(q + 1) * H])
        return out

    lstm = []
    for l in range(num_layers):
        k_in = input_dim if l == 0 else H
        wih_d = [unif((k_in, G), kH) for _ in range(D)]
        whh_d = [unif((H, G), kH) for _ in range(D)]
        b_d = [unif((1, G), kH) + unif((1, G), kH) for _ in range(D)]   # b_ih + b_hh
        lstm.append((pack_cols(wih_d, k_in), pack_cols(whh_d, H), pack_bias(b_d)))

    Hb = D * H
    ka = 1.0 / (Hb ** 0.5)
    kd = 1.0 / (da ** 0.5)
    ko = 1.0 / ((Hb * r) ** 0.5)
    return {
        "bi_num": D,
        "hidden_dim": H,
        "lstm": lstm,
        "w_att1": unif((Hb, da), ka),     # Linear(Hb, da) weight^T
        "b_att1": unif((1, da), ka),
        "w_att2": unif((da, r), kd),      # Linear(da, r, bias=False) weight^T
        "w_cls": unif((r * Hb, O_ := output_dim), ko),   # in-feature index = j*Hb + h
        "b_cls": unif((1, output_dim), ko),
    }


# --------------------------------------------------------------------------
# Forward pass wrapper: one pallas_call for the whole network.
# --------------------------------------------------------------------------
def net_forward(params, x, lengths):
    """Returns (log_probs, lengths, penalty, attention_weight) as in Net.forward."""
    B, T, Din = x.shape
    D = params["bi_num"]
    H = params["hidden_dim"]
    DH = D * H
    num_layers = len(params["lstm"])
    r = params["w_att2"].shape[1]
    O = params["b_cls"].shape[1]

    # validity mask (pack_padded_sequence semantics; requires length[b] >= 1)
    valid = (jnp.arange(T, dtype=jnp.int32)[None, :]
             < lengths.astype(jnp.int32)[:, None]).astype(jnp.float32)   # (B, T)
    mask_tb = jnp.transpose(valid)                                       # (T, B)

    # per-step freeze mask, fused over directions: row t*B+b,
    # cols [0:H) = valid(b, t), cols [H:2H) = valid(b, T-1-t)
    vf = mask_tb.reshape(T * B, 1)
    if D == 2:
        vb = jnp.transpose(valid[:, ::-1]).reshape(T * B, 1)
        keep2 = jnp.concatenate([jnp.tile(vf, (1, H)), jnp.tile(vb, (1, H))], axis=1)
    else:
        keep2 = jnp.tile(vf, (1, H))

    # layer-0 input: [x(t) | x(T-1-t)] per row so the fused input projection is
    # already time-aligned for both directions
    x_tm = jnp.transpose(x, (1, 0, 2)).reshape(T * B, Din)
    if D == 2:
        x_rev = jnp.transpose(x[:, ::-1, :], (1, 0, 2)).reshape(T * B, Din)
        xin = jnp.concatenate([x_tm, x_rev], axis=1)                     # (T*B, 2*Din)
    else:
        xin = x_tm

    # constant 0/1 selector: row b*T+t picks source row t*B+b (batch-major gather)
    rows = jnp.arange(B * T)
    perm = jax.nn.one_hot((rows % T) * B + (rows // T), T * B, dtype=jnp.float32)

    lstm_flat = [a for layer in params["lstm"] for a in layer]
    inputs = [keep2, mask_tb, perm, xin] + lstm_flat + [
        params["w_att1"], params["b_att1"], params["w_att2"],
        params["w_cls"], params["b_cls"]]

    logp, weight, pen = pl.pallas_call(
        _make_net_kernel(num_layers, D),
        out_shape=(jax.ShapeDtypeStruct((B, O), jnp.float32),
                   jax.ShapeDtypeStruct((B, r, T), jnp.float32),
                   jax.ShapeDtypeStruct((1, 1), jnp.float32)),
        grid=(1,),
        in_specs=[_full_spec(a.shape) for a in inputs],
        out_specs=(_full_spec((B, O)), _full_spec((B, r, T)), _full_spec((1, 1))),
        scratch_shapes=[pltpu.VMEM((T * B, DH), jnp.float32),    # inter-layer buffer
                        pltpu.VMEM((T * B, DH), jnp.float32)],   # time-aligned output
        compiler_params=pltpu.CompilerParams(
            dimension_semantics=("arbitrary",),
            vmem_limit_bytes=32 * 1024 * 1024),
    )(*inputs)
    return logp, lengths, pen[0, 0], weight


if __name__ == "__main__":
    input_dim, hidden_dim, output_dim = 8, 32, 5
    num_layers, biFlag, da, r = 1, True, 16, 4
    B, T = 2, 8

    key = jax.random.PRNGKey(0)
    kx, kp = jax.random.split(key)
    x = jax.random.normal(kx, (B, T, input_dim), jnp.float32)
    lengths = jnp.array([8, 5], dtype=jnp.int32)    # must be >= 1 (pack_padded contract)

    params = init_params(kp, input_dim, hidden_dim, output_dim, num_layers, biFlag, da, r)

    fwd = jax.jit(lambda xx, ll: net_forward(params, xx, ll))
    logp, out_len, penalty, weight = fwd(x, lengths)
    jax.block_until_ready((logp, penalty, weight))

    assert logp.shape == (B, output_dim)
    assert weight.shape == (B, r, T)
    assert penalty.shape == ()
    # light numerical sanity: log-probs normalize, attention rows normalize, padding is zero
    assert bool(jnp.allclose(jnp.sum(jnp.exp(logp), axis=1), 1.0, atol=1e-3))
    assert bool(jnp.allclose(jnp.sum(weight, axis=2), 1.0, atol=5e-3))
    assert bool(jnp.all(weight[1, :, 5:] == 0.0))
    assert bool(jnp.isfinite(penalty))
    print("KERNEL_OK")
</pallas_src>

<mosaic_0001>
module attributes {stable_mosaic.version = 11 : i64} {
  func.func @kernel(%arg0: i32, %arg1: memref<16x64xf32, #tpu.memory_space<vmem>>, %arg2: memref<8x2xf32, #tpu.memory_space<vmem>>, %arg3: memref<16x16xf32, #tpu.memory_space<vmem>>, %arg4: memref<16x16xf32, #tpu.memory_space<vmem>>, %arg5: memref<16x256xf32, #tpu.memory_space<vmem>>, %arg6: memref<64x256xf32, #tpu.memory_space<vmem>>, %arg7: memref<1x256xf32, #tpu.memory_space<vmem>>, %arg8: memref<64x16xf32, #tpu.memory_space<vmem>>, %arg9: memref<1x16xf32, #tpu.memory_space<vmem>>, %arg10: memref<16x4xf32, #tpu.memory_space<vmem>>, %arg11: memref<256x5xf32, #tpu.memory_space<vmem>>, %arg12: memref<1x5xf32, #tpu.memory_space<vmem>>, %arg13: memref<2x5xf32, #tpu.memory_space<vmem>>, %arg14: memref<2x4x8xf32, #tpu.memory_space<vmem>>, %arg15: memref<1x1xf32, #tpu.memory_space<vmem>>, %arg16: memref<16x64xf32, #tpu.memory_space<vmem>>, %arg17: memref<16x64xf32, #tpu.memory_space<vmem>>) attributes {dimension_semantics = [#tpu.dimension_semantics<arbitrary>], iteration_bounds = array<i64: 1>, scalar_prefetch = 0 : i64, scratch_operands = 2 : i64, tpu.core_type = #tpu.core_type<tc>, window_params = [{pipeline_mode = #tpu.pipeline_mode<synchronous>, transform_indices = @transform_0, window_bounds = array<i64: 16, 64>}, {pipeline_mode = #tpu.pipeline_mode<synchronous>, transform_indices = @transform_1, window_bounds = array<i64: 8, 2>}, {pipeline_mode = #tpu.pipeline_mode<synchronous>, transform_indices = @transform_2, window_bounds = array<i64: 16, 16>}, {pipeline_mode = #tpu.pipeline_mode<synchronous>, transform_indices = @transform_3, window_bounds = array<i64: 16, 16>}, {pipeline_mode = #tpu.pipeline_mode<synchronous>, transform_indices = @transform_4, window_bounds = array<i64: 16, 256>}, {pipeline_mode = #tpu.pipeline_mode<synchronous>, transform_indices = @transform_5, window_bounds = array<i64: 64, 256>}, {pipeline_mode = #tpu.pipeline_mode<synchronous>, transform_indices = @transform_6, window_bounds = array<i64: 1, 256>}, {pipeline_mode = #tpu.pipeline_mode<synchronous>, transform_indices = @transform_7, window_bounds = array<i64: 64, 16>}, {pipeline_mode = #tpu.pipeline_mode<synchronous>, transform_indices = @transform_8, window_bounds = array<i64: 1, 16>}, {pipeline_mode = #tpu.pipeline_mode<synchronous>, transform_indices = @transform_9, window_bounds = array<i64: 16, 4>}, {pipeline_mode = #tpu.pipeline_mode<synchronous>, transform_indices = @transform_10, window_bounds = array<i64: 256, 5>}, {pipeline_mode = #tpu.pipeline_mode<synchronous>, transform_indices = @transform_11, window_bounds = array<i64: 1, 5>}, {pipeline_mode = #tpu.pipeline_mode<synchronous>, transform_indices = @transform_12, window_bounds = array<i64: 2, 5>}, {pipeline_mode = #tpu.pipeline_mode<synchronous>, transform_indices = @transform_13, window_bounds = array<i64: 2, 4, 8>}, {pipeline_mode = #tpu.pipeline_mode<synchronous>, transform_indices = @transform_14, window_bounds = array<i64: 1, 1>}]} {
    %c0 = arith.constant 0 : index
    %c0_0 = arith.constant 0 : index
    %0 = vector.load %arg5[%c0, %c0_0] : memref<16x256xf32, #tpu.memory_space<vmem>>, vector<16x256xf32>
    %c0_1 = arith.constant 0 : index
    %c0_2 = arith.constant 0 : index
    %1 = vector.load %arg6[%c0_1, %c0_2] : memref<64x256xf32, #tpu.memory_space<vmem>>, vector<64x256xf32>
    %c0_3 = arith.constant 0 : index
    %c0_4 = arith.constant 0 : index
    %2 = vector.load %arg7[%c0_3, %c0_4] : memref<1x256xf32, #tpu.memory_space<vmem>>, vector<1x256xf32>
    %c0_5 = arith.constant 0 : index
    %c0_6 = arith.constant 0 : index
    %3 = vector.load %arg4[%c0_5, %c0_6] : memref<16x16xf32, #tpu.memory_space<vmem>>, vector<16x16xf32>
    %cst = arith.constant dense<0.000000e+00> : vector<16x256xf32>
    %4 = tpu.matmul %3, %0, %cst {dimension_numbers = #tpu.dot_dimension_numbers<[1], [0], [0], [1], [0, 0, 1, 1], [], []>} : vector<16x16xf32>, vector<16x256xf32>, vector<16x256xf32> -> vector<16x256xf32>
    %5 = vector.broadcast %2 : vector<1x256xf32> to vector<16x256xf32>
    %6 = arith.addf %4, %5 : vector<16x256xf32>
    %cst_7 = arith.constant 0.000000e+00 : f32
    %7 = vector.broadcast %cst_7 : f32 to vector<2x64xf32>
    %cst_8 = arith.constant 0.000000e+00 : f32
    %8 = vector.broadcast %cst_8 : f32 to vector<2x64xf32>
    %cst_9 = arith.constant dense<0.000000e+00> : vector<2x256xf32>
    %9 = tpu.matmul %7, %1, %cst_9 {dimension_numbers = #tpu.dot_dimension_numbers<[1], [0], [0], [1], [0, 0, 1, 1], [], []>} : vector<2x64xf32>, vector<64x256xf32>, vector<2x256xf32> -> vector<2x256xf32>
    %10 = vector.extract_strided_slice %6 {offsets = [0, 0], sizes = [2, 256], strides = [1, 1]} : vector<16x256xf32> to vector<2x256xf32>
    %11 = arith.addf %9, %10 : vector<2x256xf32>
    %c0_10 = arith.constant 0 : index
    %c0_11 = arith.constant 0 : index
    %12 = vector.load %arg1[%c0_10, %c0_11] : memref<16x64xf32, #tpu.memory_space<vmem>>, vector<2x64xf32>
    %cst_12 = arith.constant 0.000000e+00 : f32
    %13 = vector.broadcast %cst_12 : f32 to vector<2x64xf32>
    %14 = arith.cmpf ogt, %12, %13 : vector<2x64xf32>
    %15 = vector.extract_strided_slice %11 {offsets = [0, 0], sizes = [2, 192], strides = [1, 1]} : vector<2x256xf32> to vector<2x192xf32>
    %16 = arith.negf %15 : vector<2x192xf32>
    %17 = math.exp %16 : vector<2x192xf32>
    %cst_13 = arith.constant 1.000000e+00 : f32
    %18 = vector.broadcast %cst_13 : f32 to vector<2x192xf32>
    %19 = arith.addf %18, %17 : vector<2x192xf32>
    %20 = arith.divf %18, %19 : vector<2x192xf32>
    %21 = vector.extract_strided_slice %11 {offsets = [0, 192], sizes = [2, 64], strides = [1, 1]} : vector<2x256xf32> to vector<2x64xf32>
    %22 = math.tanh %21 : vector<2x64xf32>
    %23 = vector.extract_strided_slice %20 {offsets = [0, 64], sizes = [2, 64], strides = [1, 1]} : vector<2x192xf32> to vector<2x64xf32>
    %24 = arith.mulf %23, %8 : vector<2x64xf32>
    %25 = vector.extract_strided_slice %20 {offsets = [0, 0], sizes = [2, 64], strides = [1, 1]} : vector<2x192xf32> to vector<2x64xf32>
    %26 = arith.mulf %25, %22 : vector<2x64xf32>
    %27 = arith.addf %24, %26 : vector<2x64xf32>
    %28 = vector.extract_strided_slice %20 {offsets = [0, 128], sizes = [2, 64], strides = [1, 1]} : vector<2x192xf32> to vector<2x64xf32>
    %29 = math.tanh %27 : vector<2x64xf32>
    %30 = arith.mulf %28, %29 : vector<2x64xf32>
    %31 = arith.select %14, %27, %8 : vector<2x64xi1>, vector<2x64xf32>
    %32 = arith.select %14, %30, %7 : vector<2x64xi1>, vector<2x64xf32>
    %33 = vector.extract_strided_slice %32 {offsets = [0, 0], sizes = [2, 32], strides = [1, 1]} : vector<2x64xf32> to vector<2x32xf32>
    %c0_14 = arith.constant 0 : index
    %c0_15 = arith.constant 0 : index
    %34 = vector.load %arg17[%c0_14, %c0_15] : memref<16x64xf32, #tpu.memory_space<vmem>>, vector<2x32xf32>
    tpu.vector_store %arg17[%c0_14, %c0_15], %33 {strides = array<i32>} : memref<16x64xf32, #tpu.memory_space<vmem>>, vector<2x32xf32>,
    %35 = vector.extract_strided_slice %32 {offsets = [0, 32], sizes = [2, 32], strides = [1, 1]} : vector<2x64xf32> to vector<2x32xf32>
    %c14 = arith.constant 14 : index
    %c32 = arith.constant 32 : index
    %36 = vector.load %arg17[%c14, %c32] : memref<16x64xf32, #tpu.memory_space<vmem>>, vector<2x32xf32>
    tpu.vector_store %arg17[%c14, %c32], %35 {strides = array<i32>} : memref<16x64xf32, #tpu.memory_space<vmem>>, vector<2x32xf32>,
    %cst_16 = arith.constant dense<0.000000e+00> : vector<2x256xf32>
    %37 = tpu.matmul %32, %1, %cst_16 {dimension_numbers = #tpu.dot_dimension_numbers<[1], [0], [0], [1], [0, 0, 1, 1], [], []>} : vector<2x64xf32>, vector<64x256xf32>, vector<2x256xf32> -> vector<2x256xf32>
    %38 = vector.extract_strided_slice %6 {offsets = [2, 0], sizes = [2, 256], strides = [1, 1]} : vector<16x256xf32> to vector<2x256xf32>
    %39 = arith.addf %37, %38 : vector<2x256xf32>
    %c2 = arith.constant 2 : index
    %c0_17 = arith.constant 0 : index
    %40 = vector.load %arg1[%c2, %c0_17] : memref<16x64xf32, #tpu.memory_space<vmem>>, vector<2x64xf32>
    %cst_18 = arith.constant 0.000000e+00 : f32
    %41 = vector.broadcast %cst_18 : f32 to vector<2x64xf32>
    %42 = arith.cmpf ogt, %40, %41 : vector<2x64xf32>
    %43 = vector.extract_strided_slice %39 {offsets = [0, 0], sizes = [2, 192], strides = [1, 1]} : vector<2x256xf32> to vector<2x192xf32>
    %44 = arith.negf %43 : vector<2x192xf32>
    %45 = math.exp %44 : vector<2x192xf32>
    %cst_19 = arith.constant 1.000000e+00 : f32
    %46 = vector.broadcast %cst_19 : f32 to vector<2x192xf32>
    %47 = arith.addf %46, %45 : vector<2x192xf32>
    %48 = arith.divf %46, %47 : vector<2x192xf32>
    %49 = vector.extract_strided_slice %39 {offsets = [0, 192], sizes = [2, 64], strides = [1, 1]} : vector<2x256xf32> to vector<2x64xf32>
    %50 = math.tanh %49 : vector<2x64xf32>
    %51 = vector.extract_strided_slice %48 {offsets = [0, 64], sizes = [2, 64], strides = [1, 1]} : vector<2x192xf32> to vector<2x64xf32>
    %52 = arith.mulf %51, %31 : vector<2x64xf32>
    %53 = vector.extract_strided_slice %48 {offsets = [0, 0], sizes = [2, 64], strides = [1, 1]} : vector<2x192xf32> to vector<2x64xf32>
    %54 = arith.mulf %53, %50 : vector<2x64xf32>
    %55 = arith.addf %52, %54 : vector<2x64xf32>
    %56 = vector.extract_strided_slice %48 {offsets = [0, 128], sizes = [2, 64], strides = [1, 1]} : vector<2x192xf32> to vector<2x64xf32>
    %57 = math.tanh %55 : vector<2x64xf32>
    %58 = arith.mulf %56, %57 : vector<2x64xf32>
    %59 = arith.select %42, %55, %31 : vector<2x64xi1>, vector<2x64xf32>
    %60 = arith.select %42, %58, %32 : vector<2x64xi1>, vector<2x64xf32>
    %61 = vector.extract_strided_slice %60 {offsets = [0, 0], sizes = [2, 32], strides = [1, 1]} : vector<2x64xf32> to vector<2x32xf32>
    %c2_20 = arith.constant 2 : index
    %c0_21 = arith.constant 0 : index
    %62 = vector.load %arg17[%c2_20, %c0_21] : memref<16x64xf32, #tpu.memory_space<vmem>>, vector<2x32xf32>
    tpu.vector_store %arg17[%c2_20, %c0_21], %61 {strides = array<i32>} : memref<16x64xf32, #tpu.memory_space<vmem>>, vector<2x32xf32>,
    %63 = vector.extract_strided_slice %60 {offsets = [0, 32], sizes = [2, 32], strides = [1, 1]} : vector<2x64xf32> to vector<2x32xf32>
    %c12 = arith.constant 12 : index
    %c32_22 = arith.constant 32 : index
    %64 = vector.load %arg17[%c12, %c32_22] : memref<16x64xf32, #tpu.memory_space<vmem>>, vector<2x32xf32>
    tpu.vector_store %arg17[%c12, %c32_22], %63 {strides = array<i32>} : memref<16x64xf32, #tpu.memory_space<vmem>>, vector<2x32xf32>,
    %cst_23 = arith.constant dense<0.000000e+00> : vector<2x256xf32>
    %65 = tpu.matmul %60, %1, %cst_23 {dimension_numbers = #tpu.dot_dimension_numbers<[1], [0], [0], [1], [0, 0, 1, 1], [], []>} : vector<2x64xf32>, vector<64x256xf32>, vector<2x256xf32> -> vector<2x256xf32>
    %66 = vector.extract_strided_slice %6 {offsets = [4, 0], sizes = [2, 256], strides = [1, 1]} : vector<16x256xf32> to vector<2x256xf32>
    %67 = arith.addf %65, %66 : vector<2x256xf32>
    %c4 = arith.constant 4 : index
    %c0_24 = arith.constant 0 : index
    %68 = vector.load %arg1[%c4, %c0_24] : memref<16x64xf32, #tpu.memory_space<vmem>>, vector<2x64xf32>
    %cst_25 = arith.constant 0.000000e+00 : f32
    %69 = vector.broadcast %cst_25 : f32 to vector<2x64xf32>
    %70 = arith.cmpf ogt, %68, %69 : vector<2x64xf32>
    %71 = vector.extract_strided_slice %67 {offsets = [0, 0], sizes = [2, 192], strides = [1, 1]} : vector<2x256xf32> to vector<2x192xf32>
    %72 = arith.negf %71 : vector<2x192xf32>
    %73 = math.exp %72 : vector<2x192xf32>
    %cst_26 = arith.constant 1.000000e+00 : f32
    %74 = vector.broadcast %cst_26 : f32 to vector<2x192xf32>
    %75 = arith.addf %74, %73 : vector<2x192xf32>
    %76 = arith.divf %74, %75 : vector<2x192xf32>
    %77 = vector.extract_strided_slice %67 {offsets = [0, 192], sizes = [2, 64], strides = [1, 1]} : vector<2x256xf32> to vector<2x64xf32>
    %78 = math.tanh %77 : vector<2x64xf32>
    %79 = vector.extract_strided_slice %76 {offsets = [0, 64], sizes = [2, 64], strides = [1, 1]} : vector<2x192xf32> to vector<2x64xf32>
    %80 = arith.mulf %79, %59 : vector<2x64xf32>
    %81 = vector.extract_strided_slice %76 {offsets = [0, 0], sizes = [2, 64], strides = [1, 1]} : vector<2x192xf32> to vector<2x64xf32>
    %82 = arith.mulf %81, %78 : vector<2x64xf32>
    %83 = arith.addf %80, %82 : vector<2x64xf32>
    %84 = vector.extract_strided_slice %76 {offsets = [0, 128], sizes = [2, 64], strides = [1, 1]} : vector<2x192xf32> to vector<2x64xf32>
    %85 = math.tanh %83 : vector<2x64xf32>
    %86 = arith.mulf %84, %85 : vector<2x64xf32>
    %87 = arith.select %70, %83, %59 : vector<2x64xi1>, vector<2x64xf32>
    %88 = arith.select %70, %86, %60 : vector<2x64xi1>, vector<2x64xf32>
    %89 = vector.extract_strided_slice %88 {offsets = [0, 0], sizes = [2, 32], strides = [1, 1]} : vector<2x64xf32> to vector<2x32xf32>
    %c4_27 = arith.constant 4 : index
    %c0_28 = arith.constant 0 : index
    %90 = vector.load %arg17[%c4_27, %c0_28] : memref<16x64xf32, #tpu.memory_space<vmem>>, vector<2x32xf32>
    tpu.vector_store %arg17[%c4_27, %c0_28], %89 {strides = array<i32>} : memref<16x64xf32, #tpu.memory_space<vmem>>, vector<2x32xf32>,
    %91 = vector.extract_strided_slice %88 {offsets = [0, 32], sizes = [2, 32], strides = [1, 1]} : vector<2x64xf32> to vector<2x32xf32>
    %c10 = arith.constant 10 : index
    %c32_29 = arith.constant 32 : index
    %92 = vector.load %arg17[%c10, %c32_29] : memref<16x64xf32, #tpu.memory_space<vmem>>, vector<2x32xf32>
    tpu.vector_store %arg17[%c10, %c32_29], %91 {strides = array<i32>} : memref<16x64xf32, #tpu.memory_space<vmem>>, vector<2x32xf32>,
    %cst_30 = arith.constant dense<0.000000e+00> : vector<2x256xf32>
    %93 = tpu.matmul %88, %1, %cst_30 {dimension_numbers = #tpu.dot_dimension_numbers<[1], [0], [0], [1], [0, 0, 1, 1], [], []>} : vector<2x64xf32>, vector<64x256xf32>, vector<2x256xf32> -> vector<2x256xf32>
    %94 = vector.extract_strided_slice %6 {offsets = [6, 0], sizes = [2, 256], strides = [1, 1]} : vector<16x256xf32> to vector<2x256xf32>
    %95 = arith.addf %93, %94 : vector<2x256xf32>
    %c6 = arith.constant 6 : index
    %c0_31 = arith.constant 0 : index
    %96 = vector.load %arg1[%c6, %c0_31] : memref<16x64xf32, #tpu.memory_space<vmem>>, vector<2x64xf32>
    %cst_32 = arith.constant 0.000000e+00 : f32
    %97 = vector.broadcast %cst_32 : f32 to vector<2x64xf32>
    %98 = arith.cmpf ogt, %96, %97 : vector<2x64xf32>
    %99 = vector.extract_strided_slice %95 {offsets = [0, 0], sizes = [2, 192], strides = [1, 1]} : vector<2x256xf32> to vector<2x192xf32>
    %100 = arith.negf %99 : vector<2x192xf32>
    %101 = math.exp %100 : vector<2x192xf32>
    %cst_33 = arith.constant 1.000000e+00 : f32
    %102 = vector.broadcast %cst_33 : f32 to vector<2x192xf32>
    %103 = arith.addf %102, %101 : vector<2x192xf32>
    %104 = arith.divf %102, %103 : vector<2x192xf32>
    %105 = vector.extract_strided_slice %95 {offsets = [0, 192], sizes = [2, 64], strides = [1, 1]} : vector<2x256xf32> to vector<2x64xf32>
    %106 = math.tanh %105 : vector<2x64xf32>
    %107 = vector.extract_strided_slice %104 {offsets = [0, 64], sizes = [2, 64], strides = [1, 1]} : vector<2x192xf32> to vector<2x64xf32>
    %108 = arith.mulf %107, %87 : vector<2x64xf32>
    %109 = vector.extract_strided_slice %104 {offsets = [0, 0], sizes = [2, 64], strides = [1, 1]} : vector<2x192xf32> to vector<2x64xf32>
    %110 = arith.mulf %109, %106 : vector<2x64xf32>
    %111 = arith.addf %108, %110 : vector<2x64xf32>
    %112 = vector.extract_strided_slice %104 {offsets = [0, 128], sizes = [2, 64], strides = [1, 1]} : vector<2x192xf32> to vector<2x64xf32>
    %113 = math.tanh %111 : vector<2x64xf32>
    %114 = arith.mulf %112, %113 : vector<2x64xf32>
    %115 = arith.select %98, %111, %87 : vector<2x64xi1>, vector<2x64xf32>
    %116 = arith.select %98, %114, %88 : vector<2x64xi1>, vector<2x64xf32>
    %117 = vector.extract_strided_slice %116 {offsets = [0, 0], sizes = [2, 32], strides = [1, 1]} : vector<2x64xf32> to vector<2x32xf32>
    %c6_34 = arith.constant 6 : index
    %c0_35 = arith.constant 0 : index
    %118 = vector.load %arg17[%c6_34, %c0_35] : memref<16x64xf32, #tpu.memory_space<vmem>>, vector<2x32xf32>
    tpu.vector_store %arg17[%c6_34, %c0_35], %117 {strides = array<i32>} : memref<16x64xf32, #tpu.memory_space<vmem>>, vector<2x32xf32>,
    %119 = vector.extract_strided_slice %116 {offsets = [0, 32], sizes = [2, 32], strides = [1, 1]} : vector<2x64xf32> to vector<2x32xf32>
    %c8 = arith.constant 8 : index
    %c32_36 = arith.constant 32 : index
    %120 = vector.load %arg17[%c8, %c32_36] : memref<16x64xf32, #tpu.memory_space<vmem>>, vector<2x32xf32>
    tpu.vector_store %arg17[%c8, %c32_36], %119 {strides = array<i32>} : memref<16x64xf32, #tpu.memory_space<vmem>>, vector<2x32xf32>,
    %cst_37 = arith.constant dense<0.000000e+00> : vector<2x256xf32>
    %121 = tpu.matmul %116, %1, %cst_37 {dimension_numbers = #tpu.dot_dimension_numbers<[1], [0], [0], [1], [0, 0, 1, 1], [], []>} : vector<2x64xf32>, vector<64x256xf32>, vector<2x256xf32> -> vector<2x256xf32>
    %122 = vector.extract_strided_slice %6 {offsets = [8, 0], sizes = [2, 256], strides = [1, 1]} : vector<16x256xf32> to vector<2x256xf32>
    %123 = arith.addf %121, %122 : vector<2x256xf32>
    %c8_38 = arith.constant 8 : index
    %c0_39 = arith.constant 0 : index
    %124 = vector.load %arg1[%c8_38, %c0_39] : memref<16x64xf32, #tpu.memory_space<vmem>>, vector<2x64xf32>
    %cst_40 = arith.constant 0.000000e+00 : f32
    %125 = vector.broadcast %cst_40 : f32 to vector<2x64xf32>
    %126 = arith.cmpf ogt, %124, %125 : vector<2x64xf32>
    %127 = vector.extract_strided_slice %123 {offsets = [0, 0], sizes = [2, 192], strides = [1, 1]} : vector<2x256xf32> to vector<2x192xf32>
    %128 = arith.negf %127 : vector<2x192xf32>
    %129 = math.exp %128 : vector<2x192xf32>
    %cst_41 = arith.constant 1.000000e+00 : f32
    %130 = vector.broadcast %cst_41 : f32 to vector<2x192xf32>
    %131 = arith.addf %130, %129 : vector<2x192xf32>
    %132 = arith.divf %130, %131 : vector<2x192xf32>
    %133 = vector.extract_strided_slice %123 {offsets = [0, 192], sizes = [2, 64], strides = [1, 1]} : vector<2x256xf32> to vector<2x64xf32>
    %134 = math.tanh %133 : vector<2x64xf32>
    %135 = vector.extract_strided_slice %132 {offsets = [0, 64], sizes = [2, 64], strides = [1, 1]} : vector<2x192xf32> to vector<2x64xf32>
    %136 = arith.mulf %135, %115 : vector<2x64xf32>
    %137 = vector.extract_strided_slice %132 {offsets = [0, 0], sizes = [2, 64], strides = [1, 1]} : vector<2x192xf32> to vector<2x64xf32>
    %138 = arith.mulf %137, %134 : vector<2x64xf32>
    %139 = arith.addf %136, %138 : vector<2x64xf32>
    %140 = vector.extract_strided_slice %132 {offsets = [0, 128], sizes = [2, 64], strides = [1, 1]} : vector<2x192xf32> to vector<2x64xf32>
    %141 = math.tanh %139 : vector<2x64xf32>
    %142 = arith.mulf %140, %141 : vector<2x64xf32>
    %143 = arith.select %126, %139, %115 : vector<2x64xi1>, vector<2x64xf32>
    %144 = arith.select %126, %142, %116 : vector<2x64xi1>, vector<2x64xf32>
    %145 = vector.extract_strided_slice %144 {offsets = [0, 0], sizes = [2, 32], strides = [1, 1]} : vector<2x64xf32> to vector<2x32xf32>
    %c8_42 = arith.constant 8 : index
    %c0_43 = arith.constant 0 : index
    %146 = vector.load %arg17[%c8_42, %c0_43] : memref<16x64xf32, #tpu.memory_space<vmem>>, vector<2x32xf32>
    tpu.vector_store %arg17[%c8_42, %c0_43], %145 {strides = array<i32>} : memref<16x64xf32, #tpu.memory_space<vmem>>, vector<2x32xf32>,
    %147 = vector.extract_strided_slice %144 {offsets = [0, 32], sizes = [2, 32], strides = [1, 1]} : vector<2x64xf32> to vector<2x32xf32>
    %c6_44 = arith.constant 6 : index
    %c32_45 = arith.constant 32 : index
    %148 = vector.load %arg17[%c6_44, %c32_45] : memref<16x64xf32, #tpu.memory_space<vmem>>, vector<2x32xf32>
    tpu.vector_store %arg17[%c6_44, %c32_45], %147 {strides = array<i32>} : memref<16x64xf32, #tpu.memory_space<vmem>>, vector<2x32xf32>,
    %cst_46 = arith.constant dense<0.000000e+00> : vector<2x256xf32>
    %149 = tpu.matmul %144, %1, %cst_46 {dimension_numbers = #tpu.dot_dimension_numbers<[1], [0], [0], [1], [0, 0, 1, 1], [], []>} : vector<2x64xf32>, vector<64x256xf32>, vector<2x256xf32> -> vector<2x256xf32>
    %150 = vector.extract_strided_slice %6 {offsets = [10, 0], sizes = [2, 256], strides = [1, 1]} : vector<16x256xf32> to vector<2x256xf32>
    %151 = arith.addf %149, %150 : vector<2x256xf32>
    %c10_47 = arith.constant 10 : index
    %c0_48 = arith.constant 0 : index
    %152 = vector.load %arg1[%c10_47, %c0_48] : memref<16x64xf32, #tpu.memory_space<vmem>>, vector<2x64xf32>
    %cst_49 = arith.constant 0.000000e+00 : f32
    %153 = vector.broadcast %cst_49 : f32 to vector<2x64xf32>
    %154 = arith.cmpf ogt, %152, %153 : vector<2x64xf32>
    %155 = vector.extract_strided_slice %151 {offsets = [0, 0], sizes = [2, 192], strides = [1, 1]} : vector<2x256xf32> to vector<2x192xf32>
    %156 = arith.negf %155 : vector<2x192xf32>
    %157 = math.exp %156 : vector<2x192xf32>
    %cst_50 = arith.constant 1.000000e+00 : f32
    %158 = vector.broadcast %cst_50 : f32 to vector<2x192xf32>
    %159 = arith.addf %158, %157 : vector<2x192xf32>
    %160 = arith.divf %158, %159 : vector<2x192xf32>
    %161 = vector.extract_strided_slice %151 {offsets = [0, 192], sizes = [2, 64], strides = [1, 1]} : vector<2x256xf32> to vector<2x64xf32>
    %162 = math.tanh %161 : vector<2x64xf32>
    %163 = vector.extract_strided_slice %160 {offsets = [0, 64], sizes = [2, 64], strides = [1, 1]} : vector<2x192xf32> to vector<2x64xf32>
    %164 = arith.mulf %163, %143 : vector<2x64xf32>
    %165 = vector.extract_strided_slice %160 {offsets = [0, 0], sizes = [2, 64], strides = [1, 1]} : vector<2x192xf32> to vector<2x64xf32>
    %166 = arith.mulf %165, %162 : vector<2x64xf32>
    %167 = arith.addf %164, %166 : vector<2x64xf32>
    %168 = vector.extract_strided_slice %160 {offsets = [0, 128], sizes = [2, 64], strides = [1, 1]} : vector<2x192xf32> to vector<2x64xf32>
    %169 = math.tanh %167 : vector<2x64xf32>
    %170 = arith.mulf %168, %169 : vector<2x64xf32>
    %171 = arith.select %154, %167, %143 : vector<2x64xi1>, vector<2x64xf32>
    %172 = arith.select %154, %170, %144 : vector<2x64xi1>, vector<2x64xf32>
    %173 = vector.extract_strided_slice %172 {offsets = [0, 0], sizes = [2, 32], strides = [1, 1]} : vector<2x64xf32> to vector<2x32xf32>
    %c10_51 = arith.constant 10 : index
    %c0_52 = arith.constant 0 : index
    %174 = vector.load %arg17[%c10_51, %c0_52] : memref<16x64xf32, #tpu.memory_space<vmem>>, vector<2x32xf32>
    tpu.vector_store %arg17[%c10_51, %c0_52], %173 {strides = array<i32>} : memref<16x64xf32, #tpu.memory_space<vmem>>, vector<2x32xf32>,
    %175 = vector.extract_strided_slice %172 {offsets = [0, 32], sizes = [2, 32], strides = [1, 1]} : vector<2x64xf32> to vector<2x32xf32>
    %c4_53 = arith.constant 4 : index
    %c32_54 = arith.constant 32 : index
    %176 = vector.load %arg17[%c4_53, %c32_54] : memref<16x64xf32, #tpu.memory_space<vmem>>, vector<2x32xf32>
    tpu.vector_store %arg17[%c4_53, %c32_54], %175 {strides = array<i32>} : memref<16x64xf32, #tpu.memory_space<vmem>>, vector<2x32xf32>,
    %cst_55 = arith.constant dense<0.000000e+00> : vector<2x256xf32>
    %177 = tpu.matmul %172, %1, %cst_55 {dimension_numbers = #tpu.dot_dimension_numbers<[1], [0], [0], [1], [0, 0, 1, 1], [], []>} : vector<2x64xf32>, vector<64x256xf32>, vector<2x256xf32> -> vector<2x256xf32>
    %178 = vector.extract_strided_slice %6 {offsets = [12, 0], sizes = [2, 256], strides = [1, 1]} : vector<16x256xf32> to vector<2x256xf32>
    %179 = arith.addf %177, %178 : vector<2x256xf32>
    %c12_56 = arith.constant 12 : index
    %c0_57 = arith.constant 0 : index
    %180 = vector.load %arg1[%c12_56, %c0_57] : memref<16x64xf32, #tpu.memory_space<vmem>>, vector<2x64xf32>
    %cst_58 = arith.constant 0.000000e+00 : f32
    %181 = vector.broadcast %cst_58 : f32 to vector<2x64xf32>
    %182 = arith.cmpf ogt, %180, %181 : vector<2x64xf32>
    %183 = vector.extract_strided_slice %179 {offsets = [0, 0], sizes = [2, 192], strides = [1, 1]} : vector<2x256xf32> to vector<2x192xf32>
    %184 = arith.negf %183 : vector<2x192xf32>
    %185 = math.exp %184 : vector<2x192xf32>
    %cst_59 = arith.constant 1.000000e+00 : f32
    %186 = vector.broadcast %cst_59 : f32 to vector<2x192xf32>
    %187 = arith.addf %186, %185 : vector<2x192xf32>
    %188 = arith.divf %186, %187 : vector<2x192xf32>
    %189 = vector.extract_strided_slice %179 {offsets = [0, 192], sizes = [2, 64], strides = [1, 1]} : vector<2x256xf32> to vector<2x64xf32>
    %190 = math.tanh %189 : vector<2x64xf32>
    %191 = vector.extract_strided_slice %188 {offsets = [0, 64], sizes = [2, 64], strides = [1, 1]} : vector<2x192xf32> to vector<2x64xf32>
    %192 = arith.mulf %191, %171 : vector<2x64xf32>
    %193 = vector.extract_strided_slice %188 {offsets = [0, 0], sizes = [2, 64], strides = [1, 1]} : vector<2x192xf32> to vector<2x64xf32>
    %194 = arith.mulf %193, %190 : vector<2x64xf32>
    %195 = arith.addf %192, %194 : vector<2x64xf32>
    %196 = vector.extract_strided_slice %188 {offsets = [0, 128], sizes = [2, 64], strides = [1, 1]} : vector<2x192xf32> to vector<2x64xf32>
    %197 = math.tanh %195 : vector<2x64xf32>
    %198 = arith.mulf %196, %197 : vector<2x64xf32>
    %199 = arith.select %182, %195, %171 : vector<2x64xi1>, vector<2x64xf32>
    %200 = arith.select %182, %198, %172 : vector<2x64xi1>, vector<2x64xf32>
    %201 = vector.extract_strided_slice %200 {offsets = [0, 0], sizes = [2, 32], strides = [1, 1]} : vector<2x64xf32> to vector<2x32xf32>
    %c12_60 = arith.constant 12 : index
    %c0_61 = arith.constant 0 : index
    %202 = vector.load %arg17[%c12_60, %c0_61] : memref<16x64xf32, #tpu.memory_space<vmem>>, vector<2x32xf32>
    tpu.vector_store %arg17[%c12_60, %c0_61], %201 {strides = array<i32>} : memref<16x64xf32, #tpu.memory_space<vmem>>, vector<2x32xf32>,
    %203 = vector.extract_strided_slice %200 {offsets = [0, 32], sizes = [2, 32], strides = [1, 1]} : vector<2x64xf32> to vector<2x32xf32>
    %c2_62 = arith.constant 2 : index
    %c32_63 = arith.constant 32 : index
    %204 = vector.load %arg17[%c2_62, %c32_63] : memref<16x64xf32, #tpu.memory_space<vmem>>, vector<2x32xf32>
    tpu.vector_store %arg17[%c2_62, %c32_63], %203 {strides = array<i32>} : memref<16x64xf32, #tpu.memory_space<vmem>>, vector<2x32xf32>,
    %cst_64 = arith.constant dense<0.000000e+00> : vector<2x256xf32>
    %205 = tpu.matmul %200, %1, %cst_64 {dimension_numbers = #tpu.dot_dimension_numbers<[1], [0], [0], [1], [0, 0, 1, 1], [], []>} : vector<2x64xf32>, vector<64x256xf32>, vector<2x256xf32> -> vector<2x256xf32>
    %206 = vector.extract_strided_slice %6 {offsets = [14, 0], sizes = [2, 256], strides = [1, 1]} : vector<16x256xf32> to vector<2x256xf32>
    %207 = arith.addf %205, %206 : vector<2x256xf32>
    %c14_65 = arith.constant 14 : index
    %c0_66 = arith.constant 0 : index
    %208 = vector.load %arg1[%c14_65, %c0_66] : memref<16x64xf32, #tpu.memory_space<vmem>>, vector<2x64xf32>
    %cst_67 = arith.constant 0.000000e+00 : f32
    %209 = vector.broadcast %cst_67 : f32 to vector<2x64xf32>
    %210 = arith.cmpf ogt, %208, %209 : vector<2x64xf32>
    %211 = vector.extract_strided_slice %207 {offsets = [0, 0], sizes = [2, 192], strides = [1, 1]} : vector<2x256xf32> to vector<2x192xf32>
    %212 = arith.negf %211 : vector<2x192xf32>
    %213 = math.exp %212 : vector<2x192xf32>
    %cst_68 = arith.constant 1.000000e+00 : f32
    %214 = vector.broadcast %cst_68 : f32 to vector<2x192xf32>
    %215 = arith.addf %214, %213 : vector<2x192xf32>
    %216 = arith.divf %214, %215 : vector<2x192xf32>
    %217 = vector.extract_strided_slice %207 {offsets = [0, 192], sizes = [2, 64], strides = [1, 1]} : vector<2x256xf32> to vector<2x64xf32>
    %218 = math.tanh %217 : vector<2x64xf32>
    %219 = vector.extract_strided_slice %216 {offsets = [0, 64], sizes = [2, 64], strides = [1, 1]} : vector<2x192xf32> to vector<2x64xf32>
    %220 = arith.mulf %219, %199 : vector<2x64xf32>
    %221 = vector.extract_strided_slice %216 {offsets = [0, 0], sizes = [2, 64], strides = [1, 1]} : vector<2x192xf32> to vector<2x64xf32>
    %222 = arith.mulf %221, %218 : vector<2x64xf32>
    %223 = arith.addf %220, %222 : vector<2x64xf32>
    %224 = vector.extract_strided_slice %216 {offsets = [0, 128], sizes = [2, 64], strides = [1, 1]} : vector<2x192xf32> to vector<2x64xf32>
    %225 = math.tanh %223 : vector<2x64xf32>
    %226 = arith.mulf %224, %225 : vector<2x64xf32>
    %227 = arith.select %210, %226, %200 : vector<2x64xi1>, vector<2x64xf32>
    %228 = vector.extract_strided_slice %227 {offsets = [0, 0], sizes = [2, 32], strides = [1, 1]} : vector<2x64xf32> to vector<2x32xf32>
    %c14_69 = arith.constant 14 : index
    %c0_70 = arith.constant 0 : index
    %229 = vector.load %arg17[%c14_69, %c0_70] : memref<16x64xf32, #tpu.memory_space<vmem>>, vector<2x32xf32>
    tpu.vector_store %arg17[%c14_69, %c0_70], %228 {strides = array<i32>} : memref<16x64xf32, #tpu.memory_space<vmem>>, vector<2x32xf32>,
    %230 = vector.extract_strided_slice %227 {offsets = [0, 32], sizes = [2, 32], strides = [1, 1]} : vector<2x64xf32> to vector<2x32xf32>
    %c0_71 = arith.constant 0 : index
    %c32_72 = arith.constant 32 : index
    %231 = vector.load %arg17[%c0_71, %c32_72] : memref<16x64xf32, #tpu.memory_space<vmem>>, vector<2x32xf32>
    tpu.vector_store %arg17[%c0_71, %c32_72], %230 {strides = array<i32>} : memref<16x64xf32, #tpu.memory_space<vmem>>, vector<2x32xf32>,
    %c0_73 = arith.constant 0 : index
    %c0_74 = arith.constant 0 : index
    %232 = vector.load %arg17[%c0_73, %c0_74] : memref<16x64xf32, #tpu.memory_space<vmem>>, vector<16x64xf32>
    %c0_75 = arith.constant 0 : index
    %c0_76 = arith.constant 0 : index
    %233 = vector.load %arg8[%c0_75, %c0_76] : memref<64x16xf32, #tpu.memory_space<vmem>>, vector<64x16xf32>
    %cst_77 = arith.constant dense<0.000000e+00> : vector<16x16xf32>
    %234 = tpu.matmul %232, %233, %cst_77 {dimension_numbers = #tpu.dot_dimension_numbers<[1], [0], [0], [1], [0, 0, 1, 1], [], []>} : vector<16x64xf32>, vector<64x16xf32>, vector<16x16xf32> -> vector<16x16xf32>
    %c0_78 = arith.constant 0 : index
    %c0_79 = arith.constant 0 : index
    %235 = vector.load %arg9[%c0_78, %c0_79] : memref<1x16xf32, #tpu.memory_space<vmem>>, vector<1x16xf32>
    %236 = vector.broadcast %235 : vector<1x16xf32> to vector<16x16xf32>
    %237 = arith.addf %234, %236 : vector<16x16xf32>
    %238 = math.tanh %237 : vector<16x16xf32>
    %c0_80 = arith.constant 0 : index
    %c0_81 = arith.constant 0 : index
    %239 = vector.load %arg10[%c0_80, %c0_81] : memref<16x4xf32, #tpu.memory_space<vmem>>, vector<16x4xf32>
    %cst_82 = arith.constant dense<0.000000e+00> : vector<16x4xf32>
    %240 = tpu.matmul %238, %239, %cst_82 {dimension_numbers = #tpu.dot_dimension_numbers<[1], [0], [0], [1], [0, 0, 1, 1], [], []>} : vector<16x16xf32>, vector<16x4xf32>, vector<16x4xf32> -> vector<16x4xf32>
    %c0_83 = arith.constant 0 : index
    %c0_84 = arith.constant 0 : index
    %241 = vector.load %arg3[%c0_83, %c0_84] : memref<16x16xf32, #tpu.memory_space<vmem>>, vector<16x16xf32>
    %cst_85 = arith.constant dense<0.000000e+00> : vector<16x64xf32>
    %242 = tpu.matmul %241, %232, %cst_85 {dimension_numbers = #tpu.dot_dimension_numbers<[1], [0], [0], [1], [0, 0, 1, 1], [], []>} : vector<16x16xf32>, vector<16x64xf32>, vector<16x64xf32> -> vector<16x64xf32>
    %cst_86 = arith.constant dense<0.000000e+00> : vector<16x4xf32>
    %243 = tpu.matmul %241, %240, %cst_86 {dimension_numbers = #tpu.dot_dimension_numbers<[1], [0], [0], [1], [0, 0, 1, 1], [], []>} : vector<16x16xf32>, vector<16x4xf32>, vector<16x4xf32> -> vector<16x4xf32>
    %c0_87 = arith.constant 0 : index
    %c0_88 = arith.constant 0 : index
    %244 = vector.load %arg2[%c0_87, %c0_88] : memref<8x2xf32, #tpu.memory_space<vmem>>, vector<8x2xf32>
    %c0_89 = arith.constant 0 : index
    %c0_90 = arith.constant 0 : index
    %245 = vector.load %arg11[%c0_89, %c0_90] : memref<256x5xf32, #tpu.memory_space<vmem>>, vector<256x5xf32>
    %c0_91 = arith.constant 0 : index
    %c0_92 = arith.constant 0 : index
    %246 = vector.load %arg12[%c0_91, %c0_92] : memref<1x5xf32, #tpu.memory_space<vmem>>, vector<1x5xf32>
    %cst_93 = arith.constant 0.000000e+00 : f32
    %247 = vector.broadcast %cst_93 : f32 to vector<1x1xf32>
    %248 = vector.extract_strided_slice %242 {offsets = [0, 0], sizes = [8, 64], strides = [1, 1]} : vector<16x64xf32> to vector<8x64xf32>
    %249 = vector.extract_strided_slice %243 {offsets = [0, 0], sizes = [8, 4], strides = [1, 1]} : vector<16x4xf32> to vector<8x4xf32>
    %250 = vector.extract_strided_slice %244 {offsets = [0, 0], sizes = [8, 1], strides = [1, 1]} : vector<8x2xf32> to vector<8x1xf32>
    %cst_94 = arith.constant 0.000000e+00 : f32
    %251 = vector.broadcast %cst_94 : f32 to vector<8x1xf32>
    %252 = arith.cmpf ogt, %250, %251 : vector<8x1xf32>
    %cst_95 = arith.constant -1.000000e+30 : f32
    %253 = vector.shape_cast %252 : vector<8x1xi1> to vector<8x1xi1>
    %254 = vector.broadcast %253 : vector<8x1xi1> to vector<8x4xi1>
    %255 = vector.broadcast %cst_95 : f32 to vector<8x4xf32>
    %256 = arith.select %254, %249, %255 : vector<8x4xi1>, vector<8x4xf32>
    %cst_96 = arith.constant dense<0xFF800000> : vector<4xf32>
    %257 = vector.multi_reduction <maximumf>, %256, %cst_96 [0] : vector<8x4xf32> to vector<4xf32>
    %258 = vector.shape_cast %257 : vector<4xf32> to vector<1x4xf32>
    %259 = vector.broadcast %258 : vector<1x4xf32> to vector<8x4xf32>
    %260 = arith.subf %256, %259 : vector<8x4xf32>
    %261 = math.exp %260 : vector<8x4xf32>
    %cst_97 = arith.constant dense<0.000000e+00> : vector<4xf32>
    %262 = vector.multi_reduction <add>, %261, %cst_97 [0] : vector<8x4xf32> to vector<4xf32>
    %263 = vector.shape_cast %262 : vector<4xf32> to vector<1x4xf32>
    %264 = tpu.reciprocal %263 {approx = true} : vector<1x4xf32> -> vector<1x4xf32>
    %265 = vector.broadcast %264 : vector<1x4xf32> to vector<8x4xf32>
    %266 = arith.mulf %261, %265 : vector<8x4xf32>
    %cst_98 = arith.constant 0.000000e+00 : f32
    %267 = vector.shape_cast %252 : vector<8x1xi1> to vector<8x1xi1>
    %268 = vector.broadcast %267 : vector<8x1xi1> to vector<8x4xi1>
    %269 = vector.broadcast %cst_98 : f32 to vector<8x4xf32>
    %270 = arith.select %268, %266, %269 : vector<8x4xi1>, vector<8x4xf32>
    %271 = tpu.transpose %270, [1, 0] : vector<8x4xf32> -> vector<4x8xf32>
    %c0_99 = arith.constant 0 : index
    %c0_100 = arith.constant 0 : index
    %c0_101 = arith.constant 0 : index
    %272 = vector.load %arg14[%c0_99, %c0_100, %c0_101] : memref<2x4x8xf32, #tpu.memory_space<vmem>>, vector<1x4x8xf32>
    %273 = vector.shape_cast %272 : vector<1x4x8xf32> to vector<4x8xf32>
    %274 = vector.shape_cast %271 : vector<4x8xf32> to vector<1x4x8xf32>
    tpu.vector_store %arg14[%c0_99, %c0_100, %c0_101], %274 {strides = array<i32>} : memref<2x4x8xf32, #tpu.memory_space<vmem>>, vector<1x4x8xf32>,
    %cst_102 = arith.constant dense<0.000000e+00> : vector<4x64xf32>
    %275 = tpu.matmul %271, %248, %cst_102 {dimension_numbers = #tpu.dot_dimension_numbers<[1], [0], [0], [1], [0, 0, 1, 1], [], []>} : vector<4x8xf32>, vector<8x64xf32>, vector<4x64xf32> -> vector<4x64xf32>
    %276 = vector.extract_strided_slice %275 {offsets = [0, 0], sizes = [1, 64], strides = [1, 1]} : vector<4x64xf32> to vector<1x64xf32>
    %277 = vector.extract_strided_slice %275 {offsets = [1, 0], sizes = [1, 64], strides = [1, 1]} : vector<4x64xf32> to vector<1x64xf32>
    %278 = vector.extract_strided_slice %275 {offsets = [2, 0], sizes = [1, 64], strides = [1, 1]} : vector<4x64xf32> to vector<1x64xf32>
    %279 = vector.extract_strided_slice %275 {offsets = [3, 0], sizes = [1, 64], strides = [1, 1]} : vector<4x64xf32> to vector<1x64xf32>
    %280 = tpu.concatenate %276, %277, %278, %279 in 1 : vector<1x64xf32>, vector<1x64xf32>, vector<1x64xf32>, vector<1x64xf32> -> vector<1x256xf32>
    %cst_103 = arith.constant dense<0.000000e+00> : vector<1x5xf32>
    %281 = tpu.matmul %280, %245, %cst_103 {dimension_numbers = #tpu.dot_dimension_numbers<[1], [0], [0], [1], [0, 0, 1, 1], [], []>} : vector<1x256xf32>, vector<256x5xf32>, vector<1x5xf32> -> vector<1x5xf32>
    %282 = arith.addf %281, %246 : vector<1x5xf32>
    %283 = math.sqrt %271 : vector<4x8xf32>
    %cst_104 = arith.constant dense<0.000000e+00> : vector<4x4xf32>
    %284 = tpu.matmul %283, %283, %cst_104 {dimension_numbers = #tpu.dot_dimension_numbers<[1], [1], [0], [0], [0, 0, 1, 0], [], []>} : vector<4x8xf32>, vector<4x8xf32>, vector<4x4xf32> -> vector<4x4xf32>
    %cst_105 = arith.constant 1.000000e+00 : f32
    %285 = vector.broadcast %cst_105 : f32 to vector<4x4xf32>
    %286 = arith.subf %284, %285 : vector<4x4xf32>
    %287 = arith.mulf %286, %286 : vector<4x4xf32>
    %288 = vector.shape_cast %287 : vector<4x4xf32> to vector<1x4x4xf32>
    %cst_106 = arith.constant dense<0.000000e+00> : vector<1xf32>
    %289 = vector.multi_reduction <add>, %288, %cst_106 [1, 2] : vector<1x4x4xf32> to vector<1xf32>
    %290 = vector.shape_cast %289 : vector<1xf32> to vector<1x1x1xf32>
    %291 = vector.extract %290[0, 0, 0] : f32 from vector<1x1x1xf32>
    %292 = vector.broadcast %291 : f32 to vector<1x1xf32>
    %293 = arith.addf %247, %292 : vector<1x1xf32>
    %294 = vector.extract_strided_slice %242 {offsets = [8, 0], sizes = [8, 64], strides = [1, 1]} : vector<16x64xf32> to vector<8x64xf32>
    %295 = vector.extract_strided_slice %243 {offsets = [8, 0], sizes = [8, 4], strides = [1, 1]} : vector<16x4xf32> to vector<8x4xf32>
    %296 = vector.extract_strided_slice %244 {offsets = [0, 1], sizes = [8, 1], strides = [1, 1]} : vector<8x2xf32> to vector<8x1xf32>
    %cst_107 = arith.constant 0.000000e+00 : f32
    %297 = vector.broadcast %cst_107 : f32 to vector<8x1xf32>
    %298 = arith.cmpf ogt, %296, %297 : vector<8x1xf32>
    %cst_108 = arith.constant -1.000000e+30 : f32
    %299 = vector.shape_cast %298 : vector<8x1xi1> to vector<8x1xi1>
    %300 = vector.broadcast %299 : vector<8x1xi1> to vector<8x4xi1>
    %301 = vector.broadcast %cst_108 : f32 to vector<8x4xf32>
    %302 = arith.select %300, %295, %301 : vector<8x4xi1>, vector<8x4xf32>
    %cst_109 = arith.constant dense<0xFF800000> : vector<4xf32>
    %303 = vector.multi_reduction <maximumf>, %302, %cst_109 [0] : vector<8x4xf32> to vector<4xf32>
    %304 = vector.shape_cast %303 : vector<4xf32> to vector<1x4xf32>
    %305 = vector.broadcast %304 : vector<1x4xf32> to vector<8x4xf32>
    %306 = arith.subf %302, %305 : vector<8x4xf32>
    %307 = math.exp %306 : vector<8x4xf32>
    %cst_110 = arith.constant dense<0.000000e+00> : vector<4xf32>
    %308 = vector.multi_reduction <add>, %307, %cst_110 [0] : vector<8x4xf32> to vector<4xf32>
    %309 = vector.shape_cast %308 : vector<4xf32> to vector<1x4xf32>
    %310 = tpu.reciprocal %309 {approx = true} : vector<1x4xf32> -> vector<1x4xf32>
    %311 = vector.broadcast %310 : vector<1x4xf32> to vector<8x4xf32>
    %312 = arith.mulf %307, %311 : vector<8x4xf32>
    %cst_111 = arith.constant 0.000000e+00 : f32
    %313 = vector.shape_cast %298 : vector<8x1xi1> to vector<8x1xi1>
    %314 = vector.broadcast %313 : vector<8x1xi1> to vector<8x4xi1>
    %315 = vector.broadcast %cst_111 : f32 to vector<8x4xf32>
    %316 = arith.select %314, %312, %315 : vector<8x4xi1>, vector<8x4xf32>
    %317 = tpu.transpose %316, [1, 0] : vector<8x4xf32> -> vector<4x8xf32>
    %c1 = arith.constant 1 : index
    %c0_112 = arith.constant 0 : index
    %c0_113 = arith.constant 0 : index
    %318 = vector.load %arg14[%c1, %c0_112, %c0_113] : memref<2x4x8xf32, #tpu.memory_space<vmem>>, vector<1x4x8xf32>
    %319 = vector.shape_cast %318 : vector<1x4x8xf32> to vector<4x8xf32>
    %320 = vector.shape_cast %317 : vector<4x8xf32> to vector<1x4x8xf32>
    tpu.vector_store %arg14[%c1, %c0_112, %c0_113], %320 {strides = array<i32>} : memref<2x4x8xf32, #tpu.memory_space<vmem>>, vector<1x4x8xf32>,
    %cst_114 = arith.constant dense<0.000000e+00> : vector<4x64xf32>
    %321 = tpu.matmul %317, %294, %cst_114 {dimension_numbers = #tpu.dot_dimension_numbers<[1], [0], [0], [1], [0, 0, 1, 1], [], []>} : vector<4x8xf32>, vector<8x64xf32>, vector<4x64xf32> -> vector<4x64xf32>
    %322 = vector.extract_strided_slice %321 {offsets = [0, 0], sizes = [1, 64], strides = [1, 1]} : vector<4x64xf32> to vector<1x64xf32>
    %323 = vector.extract_strided_slice %321 {offsets = [1, 0], sizes = [1, 64], strides = [1, 1]} : vector<4x64xf32> to vector<1x64xf32>
    %324 = vector.extract_strided_slice %321 {offsets = [2, 0], sizes = [1, 64], strides = [1, 1]} : vector<4x64xf32> to vector<1x64xf32>
    %325 = vector.extract_strided_slice %321 {offsets = [3, 0], sizes = [1, 64], strides = [1, 1]} : vector<4x64xf32> to vector<1x64xf32>
    %326 = tpu.concatenate %322, %323, %324, %325 in 1 : vector<1x64xf32>, vector<1x64xf32>, vector<1x64xf32>, vector<1x64xf32> -> vector<1x256xf32>
    %cst_115 = arith.constant dense<0.000000e+00> : vector<1x5xf32>
    %327 = tpu.matmul %326, %245, %cst_115 {dimension_numbers = #tpu.dot_dimension_numbers<[1], [0], [0], [1], [0, 0, 1, 1], [], []>} : vector<1x256xf32>, vector<256x5xf32>, vector<1x5xf32> -> vector<1x5xf32>
    %328 = arith.addf %327, %246 : vector<1x5xf32>
    %329 = math.sqrt %317 : vector<4x8xf32>
    %cst_116 = arith.constant dense<0.000000e+00> : vector<4x4xf32>
    %330 = tpu.matmul %329, %329, %cst_116 {dimension_numbers = #tpu.dot_dimension_numbers<[1], [1], [0], [0], [0, 0, 1, 0], [], []>} : vector<4x8xf32>, vector<4x8xf32>, vector<4x4xf32> -> vector<4x4xf32>
    %cst_117 = arith.constant 1.000000e+00 : f32
    %331 = vector.broadcast %cst_117 : f32 to vector<4x4xf32>
    %332 = arith.subf %330, %331 : vector<4x4xf32>
    %333 = arith.mulf %332, %332 : vector<4x4xf32>
    %334 = vector.shape_cast %333 : vector<4x4xf32> to vector<1x4x4xf32>
    %cst_118 = arith.constant dense<0.000000e+00> : vector<1xf32>
    %335 = vector.multi_reduction <add>, %334, %cst_118 [1, 2] : vector<1x4x4xf32> to vector<1xf32>
    %336 = vector.shape_cast %335 : vector<1xf32> to vector<1x1x1xf32>
    %337 = vector.extract %336[0, 0, 0] : f32 from vector<1x1x1xf32>
    %338 = vector.broadcast %337 : f32 to vector<1x1xf32>
    %339 = arith.addf %293, %338 : vector<1x1xf32>
    %340 = tpu.concatenate %282, %328 in 0 : vector<1x5xf32>, vector<1x5xf32> -> vector<2x5xf32>
    %cst_119 = arith.constant dense<0xFF800000> : vector<2xf32>
    %341 = vector.multi_reduction <maximumf>, %340, %cst_119 [1] : vector<2x5xf32> to vector<2xf32>
    %342 = vector.shape_cast %341 : vector<2xf32> to vector<2x1xf32>
    %343 = vector.broadcast %342 : vector<2x1xf32> to vector<2x5xf32>
    %344 = arith.subf %340, %343 : vector<2x5xf32>
    %345 = math.exp %344 : vector<2x5xf32>
    %cst_120 = arith.constant dense<0.000000e+00> : vector<2xf32>
    %346 = vector.multi_reduction <add>, %345, %cst_120 [1] : vector<2x5xf32> to vector<2xf32>
    %347 = vector.shape_cast %346 : vector<2xf32> to vector<2x1xf32>
    %348 = math.log %347 : vector<2x1xf32>
    %349 = arith.addf %342, %348 : vector<2x1xf32>
    %350 = vector.broadcast %349 : vector<2x1xf32> to vector<2x5xf32>
    %351 = arith.subf %340, %350 : vector<2x5xf32>
    %c0_121 = arith.constant 0 : index
    %c0_122 = arith.constant 0 : index
    %352 = vector.load %arg13[%c0_121, %c0_122] : memref<2x5xf32, #tpu.memory_space<vmem>>, vector<2x5xf32>
    tpu.vector_store %arg13[%c0_121, %c0_122], %351 {strides = array<i32>} : memref<2x5xf32, #tpu.memory_space<vmem>>, vector<2x5xf32>,
    %c0_123 = arith.constant 0 : index
    %c0_124 = arith.constant 0 : index
    %353 = vector.load %arg15[%c0_123, %c0_124] : memref<1x1xf32, #tpu.memory_space<vmem>>, vector<1x1xf32>
    tpu.vector_store %arg15[%c0_123, %c0_124], %339 {strides = array<i32>} : memref<1x1xf32, #tpu.memory_space<vmem>>, vector<1x1xf32>,
    return
  }
  func.func @transform_0(%arg0: i32) -> (i32, i32) {
    %c0_i32 = arith.constant 0 : i32
    %c0_i32_0 = arith.constant 0 : i32
    %c0_i32_1 = arith.constant 0 : i32
    return %c0_i32, %c0_i32_0 : i32, i32
  }
  func.func @transform_1(%arg0: i32) -> (i32, i32) {
    %c0_i32 = arith.constant 0 : i32
    %c0_i32_0 = arith.constant 0 : i32
    %c0_i32_1 = arith.constant 0 : i32
    return %c0_i32, %c0_i32_0 : i32, i32
  }
  func.func @transform_2(%arg0: i32) -> (i32, i32) {
    %c0_i32 = arith.constant 0 : i32
    %c0_i32_0 = arith.constant 0 : i32
    %c0_i32_1 = arith.constant 0 : i32
    return %c0_i32, %c0_i32_0 : i32, i32
  }
  func.func @transform_3(%arg0: i32) -> (i32, i32) {
    %c0_i32 = arith.constant 0 : i32
    %c0_i32_0 = arith.constant 0 : i32
    %c0_i32_1 = arith.constant 0 : i32
    return %c0_i32, %c0_i32_0 : i32, i32
  }
  func.func @transform_4(%arg0: i32) -> (i32, i32) {
    %c0_i32 = arith.constant 0 : i32
    %c0_i32_0 = arith.constant 0 : i32
    %c0_i32_1 = arith.constant 0 : i32
    return %c0_i32, %c0_i32_0 : i32, i32
  }
  func.func @transform_5(%arg0: i32) -> (i32, i32) {
    %c0_i32 = arith.constant 0 : i32
    %c0_i32_0 = arith.constant 0 : i32
    %c0_i32_1 = arith.constant 0 : i32
    return %c0_i32, %c0_i32_0 : i32, i32
  }
  func.func @transform_6(%arg0: i32) -> (i32, i32) {
    %c0_i32 = arith.constant 0 : i32
    %c0_i32_0 = arith.constant 0 : i32
    %c0_i32_1 = arith.constant 0 : i32
    return %c0_i32, %c0_i32_0 : i32, i32
  }
  func.func @transform_7(%arg0: i32) -> (i32, i32) {
    %c0_i32 = arith.constant 0 : i32
    %c0_i32_0 = arith.constant 0 : i32
    %c0_i32_1 = arith.constant 0 : i32
    return %c0_i32, %c0_i32_0 : i32, i32
  }
  func.func @transform_8(%arg0: i32) -> (i32, i32) {
    %c0_i32 = arith.constant 0 : i32
    %c0_i32_0 = arith.constant 0 : i32
    %c0_i32_1 = arith.constant 0 : i32
    return %c0_i32, %c0_i32_0 : i32, i32
  }
  func.func @transform_9(%arg0: i32) -> (i32, i32) {
    %c0_i32 = arith.constant 0 : i32
    %c0_i32_0 = arith.constant 0 : i32
    %c0_i32_1 = arith.constant 0 : i32
    return %c0_i32, %c0_i32_0 : i32, i32
  }
  func.func @transform_10(%arg0: i32) -> (i32, i32) {
    %c0_i32 = arith.constant 0 : i32
    %c0_i32_0 = arith.constant 0 : i32
    %c0_i32_1 = arith.constant 0 : i32
    return %c0_i32, %c0_i32_0 : i32, i32
  }
  func.func @transform_11(%arg0: i32) -> (i32, i32) {
    %c0_i32 = arith.constant 0 : i32
    %c0_i32_0 = arith.constant 0 : i32
    %c0_i32_1 = arith.constant 0 : i32
    return %c0_i32, %c0_i32_0 : i32, i32
  }
  func.func @transform_12(%arg0: i32) -> (i32, i32) {
    %c0_i32 = arith.constant 0 : i32
    %c0_i32_0 = arith.constant 0 : i32
    %c0_i32_1 = arith.constant 0 : i32
    return %c0_i32, %c0_i32_0 : i32, i32
  }
  func.func @transform_13(%arg0: i32) -> (i32, i32, i32) {
    %c0_i32 = arith.constant 0 : i32
    %c0_i32_0 = arith.constant 0 : i32
    %c0_i32_1 = arith.constant 0 : i32
    %c0_i32_2 = arith.constant 0 : i32
    return %c0_i32, %c0_i32_0, %c0_i32_1 : i32, i32, i32
  }
  func.func @transform_14(%arg0: i32) -> (i32, i32) {
    %c0_i32 = arith.constant 0 : i32
    %c0_i32_0 = arith.constant 0 : i32
    %c0_i32_1 = arith.constant 0 : i32
    return %c0_i32, %c0_i32_0 : i32, i32
  }
}

</mosaic_0001>

<bundles_post_ra>
// kernel: _lambda_.1
= control target key start
LH: loop header
LB: loop body
LE: loop exit
PB: predicated region body
PF: predicated region fallthrough
CT: control target
= control target key end

     0   :  { %20 = vsyncpa [#allocation5], 0  ;;  %s3280_s0 = inlined_call_operand.vmem [shape: f32[16,64], index: 0, kind: input, shape index: {}]   ;;  %s3281_s1 = inlined_call_operand.vmem [shape: f32[8,2], index: 1, kind: input, shape index: {}]   ;;  %s3282_s2 = inlined_call_operand.vmem [shape: f32[16,16], index: 2, kind: input, shape index: {}]   ;;  %s3283_s3 = inlined_call_operand.vmem [shape: f32[16,16], index: 3, kind: input, shape index: {}]   ;;  %s3284_s4 = inlined_call_operand.vmem [shape: f32[16,256], index: 4, kind: input, shape index: {}]   ;;  %s3285_s5 = inlined_call_operand.hbm [shape: f32[64,256], index: 5, kind: input, shape index: {}]   ;;  %s3286_s6 = inlined_call_operand.vmem [shape: f32[1,256], index: 6, kind: input, shape index: {}]   ;;  %s3287_s7 = inlined_call_operand.hbm [shape: f32[64,16], index: 7, kind: input, shape index: {}]   ;;  %s3288_s8 = inlined_call_operand.vmem [shape: f32[1,16], index: 8, kind: input, shape index: {}]   ;;  %s3289_s9 = inlined_call_operand.vmem [shape: f32[16,4], index: 9, kind: input, shape index: {}]   ;;  %s3290_s10 = inlined_call_operand.vmem [shape: f32[256,5], index: 10, kind: input, shape index: {}]   ;;  %s3291_s11 = inlined_call_operand.vmem [shape: f32[1,5], index: 11, kind: input, shape index: {}]   ;;  %s3292_s12 = inlined_call_operand.hbm [shape: f32[2,5], index: 12, kind: output, shape index: {0}]   ;;  %s3293_s13 = inlined_call_operand.hbm [shape: f32[2,4,8], index: 13, kind: output, shape index: {1}]   ;;  %s3294_s14 = inlined_call_operand.hbm [shape: f32[1,1], index: 14, kind: output, shape index: {2}]  }
   0x1   :  { %21 = vsyncpa [#allocation8], 0 }
   0x2   :  { %22 = vsyncpa [#allocation6], 0 }
   0x3   :  { %23 = vsyncpa [#allocation11], 0  ;;  %s2681_s29 = smov [#allocation4]  }
   0x4   :  { %s39_s30 = sshll.u32 %s2681_s29, 4  ;;  %s40_s30 = int_to_ptr.vmem [resolvable:$true] %s39_s30 }
   0x5   :  { %s2581_s15 = scalar_lea.vmem %s40_s30, 2048  ;;  %p2586_p1 = scmp.lt.s32.totalorder %s40_s30, %s40_s30 }
   0x6   :  { %p2582_p0 = scmp.ne.s32.totalorder %s40_s30, %s2581_s15  ;;  %p2587_p2 = scmp.lt.s32.totalorder %s2581_s15, %s2581_s15 }
   0x8   :  { %p2588_p3 = por %p2587_p2, %p2586_p1 }
   0xa   :  { %p2589_p4 = pnand %p2588_p3, %p2582_p0 }
   0xc   :  { %2592 = shalt.err (!%p2589_p4)
}
   0xd   :  { %s2682_s16 = smov 256   ;;  %s2683_s17 = smov 16  }
   0xe   :  { %45 = dma.hbm_to_vmem [thread:$0]  %s3285_s5, 2048, %s40_s30, [#allocation5], %s2682_s16, %s2682_s16, %s2683_s17  }
   0xf   :  { %s2684_s20 = smov [#allocation7]  }
  0x10   :  { %s53_s21 = sshll.u32 %s2684_s20, 4  ;;  %s54_s21 = int_to_ptr.vmem [resolvable:$true] %s53_s21 }
  0x11   :  { %s2601_s22 = scalar_lea.vmem %s54_s21, 1024  ;;  %p2606_p6 = scmp.lt.s32.totalorder %s54_s21, %s54_s21 }
  0x12   :  { %p2602_p5 = scmp.ne.s32.totalorder %s54_s21, %s2601_s22  ;;  %p2607_p7 = scmp.lt.s32.totalorder %s2601_s22, %s2601_s22 }
  0x14   :  { %p2608_p8 = por %p2607_p7, %p2606_p6 }
  0x16   :  { %p2609_p9 = pnand %p2608_p8, %p2602_p5 }
  0x18   :  { %2612 = shalt.err (!%p2609_p9)
}
  0x19   :  { %s2685_s23 = smov 128   ;;  %s2686_s24 = smov 8  }
  0x1a   :  { %59 = dma.hbm_to_vmem [thread:$0]  %s3287_s7, 1024, %s54_s21, [#allocation8], %s2685_s23, %s2685_s23, %s2686_s24  }
  0x1b   :  { %2673 = dma.done.wait [#allocation5], 2048  }
  0x1c   :  { %2674 = vsyncadd [#allocation5], 4294965248 }
  0x1d   :  { %2675 = dma.done.wait [#allocation8], 1024  }
  0x1e   :  { %2676 = vsyncadd [#allocation8], 4294966272  ;;  %v2687_v0 = vmov 0.0   ;;  %v77_v1 = vld [vmem:[%s3284_s4 + $0x18] sm:$0xff]  ;;  %v76_v2 = vld [vmem:[%s3284_s4 + $0x10] sm:$0xff]  ;;  %vm108_vm0 = vcmask 130048   ;;  %v98_v23 = vlaneseq }
  0x1f   :  { %179 = vmatprep.mubr.f32.mxu1 %v2687_v0  ;;  %382 = vmatprep.mubr.f32.mxu0 %v2687_v0  ;;  %v75_v3 = vld [vmem:[%s3284_s4 + $0x8] sm:$0xff]  ;;  %v74_v4 = vld [vmem:[%s3284_s4] sm:$0xff]  ;;  %v2799_v8 = vld [vmem:[#allocation4 + $0x68] sm:$0xff]  ;;  %vm305_vm2 = vcmask 254976   ;;  %vm307_vm3 = vcmask 517376   ;;  %vm192_vm4 = vcmask 523264  }
  0x20   :  { %143 = vmatprep.subr.mxu1 %v77_v1  ;;  %v2791_v5 = vld [vmem:[#allocation4 + $0x78] sm:$0xff]  ;;  %v95_v6 = vld [vmem:[%s3283_s3] sm:$0xff]  ;;  %v2805_v9 = vld [vmem:[#allocation4 + $0x60] sm:$0xff]  ;;  %v99_v24 = vshrl.u32 %v98_v23, 7  ;;  %vm2691_vm13 = vmmov 0   ;;  %vm1540_vm15 = vcmask 31744  }
  0x21   :  { %144 = vmatpush1.msra.mxu1 %v76_v2  ;;  %v2796_v7 = vld [vmem:[#allocation4 + $0x70] sm:$0xff]  ;;  %334 = vmatprep.subr.mxu0 %v2791_v5  ;;  %v2808_v10 = vld [vmem:[#allocation4 + $0x58] sm:$0xff]  ;;  %v2819_v13 = vld [vmem:[#allocation4 + $0x48] sm:$0xff] }
  0x22   :  { %145 = vmatprep.subr.mxu1 %v75_v3  ;;  %335 = vmatpush1.msra.mxu0 %v2796_v7  ;;  %v96_v11 = vld [vmem:[%s3283_s3 + $0x8] sm:$0xff]  ;;  %v2815_v12 = vld [vmem:[#allocation4 + $0x50] sm:$0xff]  ;;  %v2823_v14 = vld [vmem:[#allocation4 + $0x40] sm:$0xff]  ;;  %v100_v25 = vsub.s32 0, %v99_v24  ;;  %v104_v30 = vsub.s32 1, %v99_v24  ;;  %s2692_s3 = smov [#allocation10]  }
  0x23   :  { %146 = vmatpush1.msra.mxu1 %v74_v4  ;;  %336 = vmatprep.subr.mxu0 %v2799_v8  ;;  %v2827_v15 = vld [vmem:[#allocation4 + $0x38] sm:$0xff]  ;;  %v2831_v16 = vld [vmem:[#allocation4 + $0x30] sm:$0xff]  ;;  %v2835_v17 = vld [vmem:[#allocation4 + $0x28] sm:$0xff]  ;;  %s2193_s20 = sshll.u32 %s2692_s3, 4  ;;  %s2194_s20 = int_to_ptr.vmem [resolvable:$true] %s2193_s20 }
  0x24   :  { %2223 = vmatmul.mubr.msk.f32.vlgmr.msra.gmra.mxu1 %vm108_vm0, %v95_v6  ;;  %212 = vmatprep.subr.mxu1 %v2791_v5  ;;  %v2839_v18 = vld [vmem:[#allocation4 + $0x20] sm:$0xff]  ;;  %v2843_v19 = vld [vmem:[#allocation4 + $0x18] sm:$0xff]  ;;  %v2847_v20 = vld [vmem:[#allocation4 + $0x10] sm:$0xff]  ;;  %s2613_s21 = scalar_lea.vmem %s2194_s20, 128  ;;  %p2618_p11 = scmp.lt.s32.totalorder %s2194_s20, %s2194_s20 }
  0x25   :  { %213 = vmatpush1.msra.mxu1 %v2796_v7  ;;  %185 = vmatprep.mubr.f32.mxu1 %v2687_v0  ;;  %v2851_v21 = vld [vmem:[#allocation4 + $0x8] sm:$0xff]  ;;  %v2855_v22 = vld [vmem:[#allocation4] sm:$0xff]  ;;  %v94_v26 = vld [vmem:[%s3286_s6] sm:$0x3]  ;;  %s2688_s6 = smov 64   ;;  %p2614_p10 = scmp.ne.s32.totalorder %s2194_s20, %s2613_s21 }
  0x26   :  { %214 = vmatprep.subr.mxu1 %v2799_v8  ;;  %337 = vmatpush1.msra.mxu0 %v2805_v9  ;;  %v101_v27 = vrot.slane %v94_v26, %v100_v25  ;;  %v105_v33 = vrot.slane %v94_v26, %v104_v30  ;;  %v267_v56 = vld [vmem:[%s3280_s0] sm:$0x3]  ;;  %p2619_p12 = scmp.lt.s32.totalorder %s2613_s21, %s2613_s21 }
  0x27   :  { %215 = vmatpush1.msra.mxu1 %v2805_v9  ;;  %338 = vmatprep.subr.mxu0 %v2808_v10  ;;  %vm268_vm1 = vcmp.gt.f32.partialorder %v267_v56, 0.0 }
  0x28   :  { %216 = vmatprep.subr.mxu1 %v2808_v10  ;;  %2224 = vmatmul.mubr.msk.f32.gmra.mxu1 %vm108_vm0, %v96_v11  ;;  %p2620_p13 = por %p2619_p12, %p2618_p11 }
  0x29   :  { %217 = vmatpush1.msra.mxu1 %v2815_v12  ;;  %260 = vmatprep.mubr.f32.mxu1 %v2687_v0 }
  0x2a   :  { %218 = vmatprep.subr.mxu1 %v2819_v13  ;;  %339 = vmatpush1.msra.mxu0 %v2815_v12  ;;  %p2621_p0 = pnand %p2620_p13, %p2614_p10 }
  0x2b   :  { %219 = vmatpush1.msra.mxu1 %v2823_v14  ;;  %340 = vmatprep.subr.mxu0 %v2819_v13 }
  0x2c   :  { %220 = vmatprep.subr.mxu1 %v2827_v15  ;;  %341 = vmatpush1.msra.mxu0 %v2823_v14 }
  0x2d   :  { %221 = vmatpush1.msra.mxu1 %v2831_v16  ;;  %342 = vmatprep.subr.mxu0 %v2827_v15 }
  0x2e   :  { %222 = vmatprep.subr.mxu1 %v2835_v17  ;;  %343 = vmatpush1.msra.mxu0 %v2831_v16 }
  0x2f   :  { %223 = vmatpush1.msra.mxu1 %v2839_v18  ;;  %344 = vmatprep.subr.mxu0 %v2835_v17 }
  0x30   :  { %224 = vmatprep.subr.mxu1 %v2843_v19  ;;  %345 = vmatpush1.msra.mxu0 %v2839_v18 }
  0x31   :  { %225 = vmatpush1.msra.mxu1 %v2847_v20  ;;  %346 = vmatprep.subr.mxu0 %v2843_v19 }
  0x32   :  { %226 = vmatprep.subr.mxu1 %v2851_v21  ;;  %347 = vmatpush1.msra.mxu0 %v2847_v20 }
  0x33   :  { %227 = vmatpush1.msra.mxu1 %v2855_v22  ;;  %348 = vmatprep.subr.mxu0 %v2851_v21 }
  0x34   :  { %261 = vmatmul.mubr.f32.vlgmr.msra.gmra.mxu1 %v2687_v0  ;;  %349 = vmatpush1.msra.mxu0 %v2855_v22 }
  0x35   :  { %456 = vmatprep.subr.mxu1 %v2791_v5  ;;  %504 = vmatprep.mubr.f32.mxu1 %v2687_v0 }
  0x36   :  { %457 = vmatpush1.msra.mxu1 %v2796_v7  ;;  %578 = vmatprep.subr.mxu0 %v2791_v5 }
  0x37   :  { %458 = vmatprep.subr.mxu1 %v2799_v8 }
  0x38   :  { %459 = vmatpush1.msra.mxu1 %v2805_v9 }
  0x39   :  { %460 = vmatprep.subr.mxu1 %v2808_v10 }
  0x3a   :  { %461 = vmatpush1.msra.mxu1 %v2815_v12 }
  0x3b   :  { %462 = vmatprep.subr.mxu1 %v2819_v13 }
  0x3c   :  { %463 = vmatpush1.msra.mxu1 %v2823_v14 }
  0x3d   :  { %464 = vmatprep.subr.mxu1 %v2827_v15 }
  0x3e   :  { %465 = vmatpush1.msra.mxu1 %v2831_v16 }
  0x3f   :  { %466 = vmatprep.subr.mxu1 %v2835_v17 }
  0x40   :  { %467 = vmatpush1.msra.mxu1 %v2839_v18 }
  0x41   :  { %468 = vmatprep.subr.mxu1 %v2843_v19 }
  0x42   :  { %469 = vmatpush1.msra.mxu1 %v2847_v20 }
  0x43   :  { %470 = vmatprep.subr.mxu1 %v2851_v21 }
  0x44   :  { %471 = vmatpush1.msra.mxu1 %v2855_v22 }
  0x45   :  { %696 = vmatprep.subr.mxu1 %v2791_v5 }
  0xe4   :  { %v181_v28 = vpop.f32.mrf.mxu1 }
  0xe5   :  { %v2888_v29 = vadd.f32 %v181_v28, %v101_v27 }
  0xe6   :  { %v183_v31 = vpop.f32.mrf.mxu1 }
  0xe7   :  { %v2894_v38 = vadd.f32 %v183_v31, %v105_v33  ;;  %v311_v63 = vrot.slane %v2888_v29, 2 }
  0xe8   :  { %v187_v32 = vpop.f32.mrf.mxu1 }
  0xe9   :  { %v2890_v34 = vadd.f32 %v187_v32, %v101_v27  ;;  %v312_v3 = vrot.slane %v2894_v38, 2 }
  0xea   :  { %v189_v35 = vpop.f32.mrf.mxu1 }
  0xeb   :  { %v2892_v36 = vadd.f32 %v189_v35, %v105_v33 }
  0xf4   :  { %v262_v37 = vpop.f32.mrf.mxu1 }
  0xf5   :  { %v263_v39 = vadd.f32 %v262_v37, %v2888_v29 }
  0xf6   :  { %v264_v40 = vpop.f32.mrf.mxu1 }
  0xf7   :  { %v265_v41 = vadd.f32 %v264_v40, %v2894_v38  ;;  %v2225_v43 = vmul.f32 -1.442695, %v263_v39  ;;  %v389_v40 = vld [vmem:[%s3280_s0 + $0x2] sm:$0x3] }
  0xf8   :  { %vm390_vm5 = vcmp.gt.f32.partialorder %v389_v40, 0.0 }
  0xf9   :  { %2457 = vtanh.f32 %v265_v41  ;;  %v2226_v53 = vmul.f32 -1.442695, %v265_v41 }
  0xfa   :  { %2459 = vpow2.f32 %v2225_v43 }
 0x106   :  { %v2458_v42 = vpop.eup %2457 }
 0x107   :  { %284 = vrot.lane.b32.xlu0 %v2458_v42, %s2688_s6  ;;  %v2460_v44 = vpop.eup %2459 }
 0x108   :  { %v275_v45 = vadd.f32 1.0, %v2460_v44 }
 0x10a   :  { %2461 = vrcp.f32 %v275_v45 }
 0x117   :  { %v2462_v46 = vpop.eup %2461 }
 0x118   :  { %v282_v49 = vmul.f32 0.0, %v2462_v46 }
 0x179   :  { %v285_v47 = vpop.permute.xlu0 %284 }
 0x17a   :  { %v287_v48 = vmul.f32 %v2462_v46, %v285_v47 }
 0x17c   :  { %289 = vrot.lane.b32.xlu0 %v287_v48, %s2688_s6  ;;  %v433_v48 = vrot.slane %v2888_v29, 4 }
 0x1ee   :  { %v290_v50 = vpop.permute.xlu0 %289 }
 0x1ef   :  { %v292_v51 = vadd.f32 %v290_v50, %v282_v49 }
 0x1f1   :  { %2463 = vtanh.f32 %v292_v51 }
 0x1f2   :  { %2465 = vpow2.f32 %v2226_v53 }
 0x1fe   :  { %v2464_v52 = vpop.eup %2463 }
 0x1ff   :  { %295 = vrot.lane.b32.xlu1 %v2464_v52, %s2688_s6  ;;  %v2466_v54 = vpop.eup %2465 }
 0x200   :  { %v276_v55 = vadd.f32 1.0, %v2466_v54 }
 0x202   :  { %2467 = vrcp.f32 %v276_v55 }
 0x203   :  { %300 = vrot.lane.b32.xlu1 %v292_v51, %s2688_s6  ;;  %v434_v51 = vrot.slane %v2894_v38, 4 }
 0x20f   :  { %v2468_v57 = vpop.eup %2467 }
 0x271   :  { %v296_v58 = vpop.permute.xlu1 %295 }
 0x272   :  { %v298_v59 = vmul.f32 %v2468_v57, %v296_v58 }
 0x274   :  { %v2905_v60 = vsel %vm268_vm1, %v298_v59, 0.0 }
 0x275   :  { %306 = vst.msk [vmem:[#allocation3] sm:$0x3] %vm305_vm2, %v2905_v60  ;;  %2227 = vmatmul.mubr.msk.f32.vlgmr.msra.gmra.mxu0 %vm192_vm4, %v2905_v60  ;;  %v301_v61 = vpop.permute.xlu1 %300 }
 0x276   :  { %308 = vst.msk [vmem:[#allocation3 + $0xe] sm:$0x3] %vm307_vm3, %v2905_v60  ;;  %v303_v62 = vsel %vm268_vm1, %v301_v61, 0.0  ;;  %579 = vmatpush1.msra.mxu0 %v2796_v7  ;;  %626 = vmatprep.mubr.f32.mxu0 %v2687_v0 }
 0x277   :  { %405 = vrot.lane.b32.xlu1 %v303_v62, %s2688_s6  ;;  %580 = vmatprep.subr.mxu0 %v2799_v8 }
 0x278   :  { %581 = vmatpush1.msra.mxu0 %v2805_v9 }
 0x279   :  { %582 = vmatprep.subr.mxu0 %v2808_v10 }
 0x27a   :  { %583 = vmatpush1.msra.mxu0 %v2815_v12 }
 0x27b   :  { %584 = vmatprep.subr.mxu0 %v2819_v13 }
 0x27c   :  { %585 = vmatpush1.msra.mxu0 %v2823_v14 }
 0x27d   :  { %586 = vmatprep.subr.mxu0 %v2827_v15 }
 0x27e   :  { %587 = vmatpush1.msra.mxu0 %v2831_v16 }
 0x27f   :  { %588 = vmatprep.subr.mxu0 %v2835_v17 }
 0x280   :  { %589 = vmatpush1.msra.mxu0 %v2839_v18 }
 0x281   :  { %590 = vmatprep.subr.mxu0 %v2843_v19 }
 0x282   :  { %591 = vmatpush1.msra.mxu0 %v2847_v20 }
 0x283   :  { %592 = vmatprep.subr.mxu0 %v2851_v21 }
 0x284   :  { %593 = vmatpush1.msra.mxu0 %v2855_v22 }
 0x285   :  { %820 = vmatprep.subr.mxu0 %v2791_v5 }
 0x2e9   :  { %v406_v30 = vpop.permute.xlu1 %405 }
 0x335   :  { %v384_v1 = vpop.f32.mrf.mxu0 }
 0x336   :  { %v385_v2 = vadd.f32 %v384_v1, %v311_v63 }
 0x337   :  { %v386_v4 = vpop.f32.mrf.mxu0 }
 0x338   :  { %v387_v6 = vadd.f32 %v386_v4, %v312_v3  ;;  %v2228_v23 = vmul.f32 -1.442695, %v385_v2 }
 0x33a   :  { %2469 = vtanh.f32 %v387_v6  ;;  %v2229_v37 = vmul.f32 -1.442695, %v387_v6  ;;  %v511_v6 = vld [vmem:[%s3280_s0 + $0x4] sm:$0x3] }
 0x33b   :  { %2471 = vpow2.f32 %v2228_v23  ;;  %vm512_vm6 = vcmp.gt.f32.partialorder %v511_v6, 0.0 }
 0x347   :  { %v2470_v11 = vpop.eup %2469 }
 0x348   :  { %410 = vrot.lane.b32.xlu0 %v2470_v11, %s2688_s6  ;;  %v2472_v24 = vpop.eup %2471 }
 0x349   :  { %v397_v25 = vadd.f32 1.0, %v2472_v24 }
 0x34b   :  { %2473 = vrcp.f32 %v397_v25 }
 0x358   :  { %v2474_v26 = vpop.eup %2473 }
 0x359   :  { %v408_v31 = vmul.f32 %v2474_v26, %v406_v30  ;;  %v555_v30 = vrot.slane %v2888_v29, 6 }
 0x3ba   :  { %v411_v27 = vpop.permute.xlu0 %410 }
 0x3bb   :  { %v413_v28 = vmul.f32 %v2474_v26, %v411_v27 }
 0x3bd   :  { %415 = vrot.lane.b32.xlu0 %v413_v28, %s2688_s6 }
 0x42f   :  { %v416_v32 = vpop.permute.xlu0 %415 }
 0x430   :  { %v418_v33 = vadd.f32 %v416_v32, %v408_v31 }
 0x432   :  { %2475 = vtanh.f32 %v418_v33  ;;  %426 = vrot.lane.b32.xlu0 %v418_v33, %s2688_s6  ;;  %v556_v33 = vrot.slane %v2894_v38, 6 }
 0x433   :  { %2477 = vpow2.f32 %v2229_v37 }
 0x43f   :  { %v2476_v35 = vpop.eup %2475 }
 0x440   :  { %421 = vrot.lane.b32.xlu1 %v2476_v35, %s2688_s6  ;;  %v2478_v39 = vpop.eup %2477 }
 0x441   :  { %v398_v41 = vadd.f32 1.0, %v2478_v39 }
 0x443   :  { %2479 = vrcp.f32 %v398_v41 }
 0x450   :  { %v2480_v44 = vpop.eup %2479 }
 0x4a4   :  { %v427_v42 = vpop.permute.xlu0 %426 }
 0x4a5   :  { %v429_v43 = vsel %vm390_vm5, %v427_v42, %v303_v62 }
 0x4a6   :  { %527 = vrot.lane.b32.xlu0 %v429_v43, %s2688_s6 }
 0x4b2   :  { %v422_v45 = vpop.permute.xlu1 %421 }
 0x4b3   :  { %v424_v46 = vmul.f32 %v2480_v44, %v422_v45 }
 0x4b5   :  { %v430_v47 = vsel %vm390_vm5, %v424_v46, %v2905_v60 }
 0x4b6   :  { %431 = vst.msk [vmem:[#allocation3 + $0x2] sm:$0x3] %vm305_vm2, %v430_v47  ;;  %2230 = vmatmul.mubr.msk.f32.vlgmr.msra.gmra.mxu1 %vm192_vm4, %v430_v47 }
 0x4b7   :  { %432 = vst.msk [vmem:[#allocation3 + $0xc] sm:$0x3] %vm307_vm3, %v430_v47  ;;  %697 = vmatpush1.msra.mxu1 %v2796_v7  ;;  %744 = vmatprep.mubr.f32.mxu1 %v2687_v0 }
 0x4b8   :  { %698 = vmatprep.subr.mxu1 %v2799_v8 }
 0x4b9   :  { %699 = vmatpush1.msra.mxu1 %v2805_v9 }
 0x4ba   :  { %700 = vmatprep.subr.mxu1 %v2808_v10 }
 0x4bb   :  { %701 = vmatpush1.msra.mxu1 %v2815_v12 }
 0x4bc   :  { %702 = vmatprep.subr.mxu1 %v2819_v13 }
 0x4bd   :  { %703 = vmatpush1.msra.mxu1 %v2823_v14 }
 0x4be   :  { %704 = vmatprep.subr.mxu1 %v2827_v15 }
 0x4bf   :  { %705 = vmatpush1.msra.mxu1 %v2831_v16 }
 0x4c0   :  { %706 = vmatprep.subr.mxu1 %v2835_v17 }
 0x4c1   :  { %707 = vmatpush1.msra.mxu1 %v2839_v18 }
 0x4c2   :  { %708 = vmatprep.subr.mxu1 %v2843_v19 }
 0x4c3   :  { %709 = vmatpush1.msra.mxu1 %v2847_v20 }
 0x4c4   :  { %710 = vmatprep.subr.mxu1 %v2851_v21 }
 0x4c5   :  { %711 = vmatpush1.msra.mxu1 %v2855_v22 }
 0x4c6   :  { %942 = vmatprep.subr.mxu1 %v2791_v5 }
 0x518   :  { %v528_v61 = vpop.permute.xlu0 %527 }
 0x576   :  { %v506_v49 = vpop.f32.mrf.mxu1 }
 0x577   :  { %v507_v50 = vadd.f32 %v506_v49, %v433_v48 }
 0x578   :  { %v508_v52 = vpop.f32.mrf.mxu1 }
 0x579   :  { %v509_v53 = vadd.f32 %v508_v52, %v434_v51  ;;  %v2231_v55 = vmul.f32 -1.442695, %v507_v50  ;;  %v633_v50 = vld [vmem:[%s3280_s0 + $0x6] sm:$0x3] }
 0x57a   :  { %vm634_vm7 = vcmp.gt.f32.partialorder %v633_v50, 0.0 }
 0x57b   :  { %2481 = vtanh.f32 %v509_v53  ;;  %v2232_v3 = vmul.f32 -1.442695, %v509_v53 }
 0x57c   :  { %2483 = vpow2.f32 %v2231_v55 }
 0x588   :  { %v2482_v54 = vpop.eup %2481 }
 0x589   :  { %532 = vrot.lane.b32.xlu1 %v2482_v54, %s2688_s6  ;;  %v2484_v56 = vpop.eup %2483 }
 0x58a   :  { %v519_v57 = vadd.f32 1.0, %v2484_v56 }
 0x58c   :  { %2485 = vrcp.f32 %v519_v57 }
 0x599   :  { %v2486_v58 = vpop.eup %2485 }
 0x59a   :  { %v530_v62 = vmul.f32 %v2486_v58, %v528_v61 }
 0x5fb   :  { %v533_v59 = vpop.permute.xlu1 %532 }
 0x5fc   :  { %v535_v60 = vmul.f32 %v2486_v58, %v533_v59 }
 0x5fe   :  { %537 = vrot.lane.b32.xlu1 %v535_v60, %s2688_s6 }
 0x670   :  { %v538_v63 = vpop.permute.xlu1 %537 }
 0x671   :  { %v540_v1 = vadd.f32 %v538_v63, %v530_v62 }
 0x673   :  { %2487 = vtanh.f32 %v540_v1  ;;  %548 = vrot.lane.b32.xlu1 %v540_v1, %s2688_s6 }
 0x674   :  { %2489 = vpow2.f32 %v2232_v3 }
 0x680   :  { %v2488_v2 = vpop.eup %2487 }
 0x681   :  { %543 = vrot.lane.b32.xlu0 %v2488_v2, %s2688_s6  ;;  %v2490_v4 = vpop.eup %2489 }
 0x682   :  { %v520_v11 = vadd.f32 1.0, %v2490_v4 }
 0x684   :  { %2491 = vrcp.f32 %v520_v11 }
 0x691   :  { %v2492_v25 = vpop.eup %2491 }
 0x6e5   :  { %v549_v23 = vpop.permute.xlu1 %548 }
 0x6e6   :  { %v551_v24 = vsel %vm512_vm6, %v549_v23, %v429_v43 }
 0x6e7   :  { %649 = vrot.lane.b32.xlu1 %v551_v24, %s2688_s6 }
 0x6f3   :  { %v544_v26 = vpop.permute.xlu0 %543 }
 0x6f4   :  { %v546_v27 = vmul.f32 %v2492_v25, %v544_v26 }
 0x6f6   :  { %v552_v28 = vsel %vm512_vm6, %v546_v27, %v430_v47  ;;  %vm1834_vm6 = vcmask 27648  }
 0x6f7   :  { %553 = vst.msk [vmem:[#allocation3 + $0x4] sm:$0x3] %vm305_vm2, %v552_v28  ;;  %2233 = vmatmul.mubr.msk.f32.vlgmr.msra.gmra.mxu0 %vm192_vm4, %v552_v28 }
 0x6f8   :  { %554 = vst.msk [vmem:[#allocation3 + $0xa] sm:$0x3] %vm307_vm3, %v552_v28  ;;  %821 = vmatpush1.msra.mxu0 %v2796_v7  ;;  %868 = vmatprep.mubr.f32.mxu0 %v2687_v0 }
 0x6f9   :  { %822 = vmatprep.subr.mxu0 %v2799_v8 }
 0x6fa   :  { %823 = vmatpush1.msra.mxu0 %v2805_v9 }
 0x6fb   :  { %824 = vmatprep.subr.mxu0 %v2808_v10 }
 0x6fc   :  { %825 = vmatpush1.msra.mxu0 %v2815_v12 }
 0x6fd   :  { %826 = vmatprep.subr.mxu0 %v2819_v13 }
 0x6fe   :  { %827 = vmatpush1.msra.mxu0 %v2823_v14 }
 0x6ff   :  { %828 = vmatprep.subr.mxu0 %v2827_v15 }
 0x700   :  { %829 = vmatpush1.msra.mxu0 %v2831_v16 }
 0x701   :  { %830 = vmatprep.subr.mxu0 %v2835_v17 }
 0x702   :  { %831 = vmatpush1.msra.mxu0 %v2839_v18 }
 0x703   :  { %832 = vmatprep.subr.mxu0 %v2843_v19 }
 0x704   :  { %833 = vmatpush1.msra.mxu0 %v2847_v20 }
 0x705   :  { %834 = vmatprep.subr.mxu0 %v2851_v21 }
 0x706   :  { %835 = vmatpush1.msra.mxu0 %v2855_v22 }
 0x707   :  { %1064 = vmatprep.subr.mxu0 %v2791_v5 }
 0x759   :  { %v650_v29 = vpop.permute.xlu1 %649 }
 0x7b7   :  { %v628_v31 = vpop.f32.mrf.mxu0 }
 0x7b8   :  { %v629_v32 = vadd.f32 %v628_v31, %v555_v30  ;;  %v751_v30 = vld [vmem:[%s3280_s0 + $0x8] sm:$0x3] }
 0x7b9   :  { %v630_v35 = vpop.f32.mrf.mxu0  ;;  %vm752_vm8 = vcmp.gt.f32.partialorder %v751_v30, 0.0 }
 0x7ba   :  { %v631_v37 = vadd.f32 %v630_v35, %v556_v33  ;;  %v2234_v40 = vmul.f32 -1.442695, %v629_v32 }
 0x7bc   :  { %2493 = vtanh.f32 %v631_v37  ;;  %v2235_v48 = vmul.f32 -1.442695, %v631_v37 }
 0x7bd   :  { %2495 = vpow2.f32 %v2234_v40 }
 0x7c9   :  { %v2494_v39 = vpop.eup %2493 }
 0x7ca   :  { %654 = vrot.lane.b32.xlu0 %v2494_v39, %s2688_s6  ;;  %v2496_v41 = vpop.eup %2495 }
 0x7cb   :  { %v641_v42 = vadd.f32 1.0, %v2496_v41 }
 0x7cd   :  { %2497 = vrcp.f32 %v641_v42 }
 0x7da   :  { %v2498_v43 = vpop.eup %2497 }
 0x7db   :  { %v652_v45 = vmul.f32 %v2498_v43, %v650_v29  ;;  %v875_v29 = vld [vmem:[%s3280_s0 + $0xa] sm:$0x3] }
 0x7dc   :  { %vm876_vm9 = vcmp.gt.f32.partialorder %v875_v29, 0.0 }
 0x83c   :  { %v655_v44 = vpop.permute.xlu0 %654 }
 0x83d   :  { %v657_v5 = vmul.f32 %v2498_v43, %v655_v44 }
 0x83f   :  { %659 = vrot.lane.b32.xlu0 %v657_v5, %s2688_s6 }
 0x8b1   :  { %v660_v46 = vpop.permute.xlu0 %659 }
 0x8b2   :  { %v662_v38 = vadd.f32 %v660_v46, %v652_v45 }
 0x8b4   :  { %2499 = vtanh.f32 %v662_v38  ;;  %670 = vrot.lane.b32.xlu0 %v662_v38, %s2688_s6 }
 0x8b5   :  { %2501 = vpow2.f32 %v2235_v48 }
 0x8c1   :  { %v2500_v47 = vpop.eup %2499 }
 0x8c2   :  { %665 = vrot.lane.b32.xlu1 %v2500_v47, %s2688_s6  ;;  %v2502_v49 = vpop.eup %2501 }
 0x8c3   :  { %v642_v51 = vadd.f32 1.0, %v2502_v49 }
 0x8c5   :  { %2503 = vrcp.f32 %v642_v51 }
 0x8d2   :  { %v2504_v54 = vpop.eup %2503 }
 0x926   :  { %v671_v52 = vpop.permute.xlu0 %670 }
 0x927   :  { %v673_v53 = vsel %vm634_vm7, %v671_v52, %v551_v24  ;;  %v920_v52 = vrot.slane %v2892_v36, 4 }
 0x928   :  { %767 = vrot.lane.b32.xlu0 %v673_v53, %s2688_s6 }
 0x934   :  { %v666_v55 = vpop.permute.xlu1 %665 }
 0x935   :  { %v668_v56 = vmul.f32 %v2504_v54, %v666_v55 }
 0x937   :  { %v674_v57 = vsel %vm634_vm7, %v668_v56, %v552_v28  ;;  %v919_v56 = vrot.slane %v2890_v34, 4 }
 0x938   :  { %675 = vst.msk [vmem:[#allocation3 + $0x6] sm:$0x3] %vm305_vm2, %v674_v57  ;;  %2236 = vmatmul.mubr.msk.f32.vlgmr.msra.gmra.mxu1 %vm192_vm4, %v674_v57 }
 0x939   :  { %676 = vst.msk [vmem:[#allocation3 + $0x8] sm:$0x3] %vm307_vm3, %v674_v57  ;;  %943 = vmatpush1.msra.mxu1 %v2796_v7  ;;  %990 = vmatprep.mubr.f32.mxu1 %v2687_v0 }
 0x93a   :  { %944 = vmatprep.subr.mxu1 %v2799_v8 }
 0x93b   :  { %945 = vmatpush1.msra.mxu1 %v2805_v9 }
 0x93c   :  { %946 = vmatprep.subr.mxu1 %v2808_v10 }
 0x93d   :  { %947 = vmatpush1.msra.mxu1 %v2815_v12 }
 0x93e   :  { %948 = vmatprep.subr.mxu1 %v2819_v13 }
 0x93f   :  { %949 = vmatpush1.msra.mxu1 %v2823_v14 }
 0x940   :  { %950 = vmatprep.subr.mxu1 %v2827_v15 }
 0x941   :  { %951 = vmatpush1.msra.mxu1 %v2831_v16 }
 0x942   :  { %952 = vmatprep.subr.mxu1 %v2835_v17 }
 0x943   :  { %953 = vmatpush1.msra.mxu1 %v2839_v18 }
 0x944   :  { %954 = vmatprep.subr.mxu1 %v2843_v19 }
 0x945   :  { %955 = vmatpush1.msra.mxu1 %v2847_v20 }
 0x946   :  { %956 = vmatprep.subr.mxu1 %v2851_v21 }
 0x947   :  { %957 = vmatpush1.msra.mxu1 %v2855_v22 }
 0x99a   :  { %v768_v11 = vpop.permute.xlu0 %767 }
 0x9f8   :  { %v746_v58 = vpop.f32.mrf.mxu1 }
 0x9f9   :  { %v747_v62 = vadd.f32 %v746_v58, %v2890_v34 }
 0x9fa   :  { %v748_v59 = vpop.f32.mrf.mxu1 }
 0x9fb   :  { %v749_v60 = vadd.f32 %v748_v59, %v2892_v36  ;;  %v2237_v63 = vmul.f32 -1.442695, %v747_v62 }
 0x9fd   :  { %2505 = vtanh.f32 %v749_v60  ;;  %v2238_v27 = vmul.f32 -1.442695, %v749_v60 }
 0x9fe   :  { %2507 = vpow2.f32 %v2237_v63 }
 0xa0a   :  { %v2506_v61 = vpop.eup %2505 }
 0xa0b   :  { %772 = vrot.lane.b32.xlu1 %v2506_v61, %s2688_s6  ;;  %v2508_v1 = vpop.eup %2507 }
 0xa0c   :  { %v759_v2 = vadd.f32 1.0, %v2508_v1 }
 0xa0e   :  { %2509 = vrcp.f32 %v759_v2 }
 0xa1b   :  { %v2510_v3 = vpop.eup %2509 }
 0xa1c   :  { %v770_v23 = vmul.f32 %v2510_v3, %v768_v11 }
 0xa7d   :  { %v773_v4 = vpop.permute.xlu1 %772 }
 0xa7e   :  { %v775_v6 = vmul.f32 %v2510_v3, %v773_v4 }
 0xa80   :  { %777 = vrot.lane.b32.xlu1 %v775_v6, %s2688_s6 }
 0xaf2   :  { %v778_v24 = vpop.permute.xlu1 %777 }
 0xaf3   :  { %v780_v25 = vadd.f32 %v778_v24, %v770_v23  ;;  %v997_v24 = vld [vmem:[%s3280_s0 + $0xc] sm:$0x3] }
 0xaf4   :  { %vm998_vm10 = vcmp.gt.f32.partialorder %v997_v24, 0.0 }
 0xaf5   :  { %2511 = vtanh.f32 %v780_v25  ;;  %788 = vrot.lane.b32.xlu1 %v780_v25, %s2688_s6 }
 0xaf6   :  { %2513 = vpow2.f32 %v2238_v27 }
 0xb02   :  { %v2512_v26 = vpop.eup %2511 }
 0xb03   :  { %783 = vrot.lane.b32.xlu0 %v2512_v26, %s2688_s6  ;;  %v2514_v28 = vpop.eup %2513 }
 0xb04   :  { %v760_v31 = vadd.f32 1.0, %v2514_v28 }
 0xb06   :  { %2515 = vrcp.f32 %v760_v31 }
 0xb13   :  { %v2516_v35 = vpop.eup %2515 }
 0xb67   :  { %v789_v32 = vpop.permute.xlu1 %788 }
 0xb68   :  { %v791_v33 = vsel %vm752_vm8, %v789_v32, %v673_v53 }
 0xb69   :  { %891 = vrot.lane.b32.xlu1 %v791_v33, %s2688_s6 }
 0xb75   :  { %v784_v37 = vpop.permute.xlu0 %783 }
 0xb76   :  { %v786_v39 = vmul.f32 %v2516_v35, %v784_v37  ;;  %v1042_v35 = vrot.slane %v2892_v36, 6 }
 0xb78   :  { %v792_v40 = vsel %vm752_vm8, %v786_v39, %v674_v57 }
 0xb79   :  { %793 = vst.msk [vmem:[#allocation3 + $0x8] sm:$0x3] %vm305_vm2, %v792_v40  ;;  %2239 = vmatmul.mubr.msk.f32.vlgmr.msra.gmra.mxu0 %vm192_vm4, %v792_v40 }
 0xb7a   :  { %794 = vst.msk [vmem:[#allocation3 + $0x6] sm:$0x3] %vm307_vm3, %v792_v40  ;;  %1065 = vmatpush1.msra.mxu0 %v2796_v7  ;;  %1112 = vmatprep.mubr.f32.mxu0 %v2687_v0 }
 0xb7b   :  { %1066 = vmatprep.subr.mxu0 %v2799_v8  ;;  %v798_v8 = vrot.slane %v2892_v36, 2  ;;  %v1167_v36 = vld [vmem:[#allocation7 + $0x38] sm:$0xff] }
 0xb7c   :  { %1067 = vmatpush1.msra.mxu0 %v2805_v9  ;;  %2365 = vmatprep.subr.mxu1 %v1167_v36 }
 0xb7d   :  { %1068 = vmatprep.subr.mxu0 %v2808_v10 }
 0xb7e   :  { %1069 = vmatpush1.msra.mxu0 %v2815_v12 }
 0xb7f   :  { %1070 = vmatprep.subr.mxu0 %v2819_v13  ;;  %v797_v13 = vrot.slane %v2890_v34, 2 }
 0xb80   :  { %1071 = vmatpush1.msra.mxu0 %v2823_v14 }
 0xb81   :  { %1072 = vmatprep.subr.mxu0 %v2827_v15 }
 0xb82   :  { %1073 = vmatpush1.msra.mxu0 %v2831_v16 }
 0xb83   :  { %1074 = vmatprep.subr.mxu0 %v2835_v17 }
 0xb84   :  { %1075 = vmatpush1.msra.mxu0 %v2839_v18 }
 0xb85   :  { %1076 = vmatprep.subr.mxu0 %v2843_v19 }
 0xb86   :  { %1077 = vmatpush1.msra.mxu0 %v2847_v20 }
 0xb87   :  { %1078 = vmatprep.subr.mxu0 %v2851_v21 }
 0xb88   :  { %1079 = vmatpush1.msra.mxu0 %v2855_v22 }
 0xbdb   :  { %v892_v21 = vpop.permute.xlu1 %891 }
 0xc39   :  { %v870_v7 = vpop.f32.mrf.mxu0 }
 0xc3a   :  { %v871_v14 = vadd.f32 %v870_v7, %v797_v13  ;;  %v1041_v7 = vrot.slane %v2890_v34, 6 }
 0xc3b   :  { %v872_v9 = vpop.f32.mrf.mxu0 }
 0xc3c   :  { %v873_v10 = vadd.f32 %v872_v9, %v798_v8  ;;  %v2240_v15 = vmul.f32 -1.442695, %v871_v14 }
 0xc3e   :  { %2517 = vtanh.f32 %v873_v10  ;;  %v2241_v44 = vmul.f32 -1.442695, %v873_v10 }
 0xc3f   :  { %2519 = vpow2.f32 %v2240_v15 }
 0xc4b   :  { %v2518_v12 = vpop.eup %2517 }
 0xc4c   :  { %896 = vrot.lane.b32.xlu0 %v2518_v12, %s2688_s6  ;;  %v2520_v16 = vpop.eup %2519 }
 0xc4d   :  { %v883_v17 = vadd.f32 1.0, %v2520_v16  ;;  %v1166_v16 = vld [vmem:[#allocation7 + $0x30] sm:$0xff] }
 0xc4f   :  { %2521 = vrcp.f32 %v883_v17 }
 0xc5c   :  { %v2522_v18 = vpop.eup %2521 }
 0xc5d   :  { %v894_v22 = vmul.f32 %v2522_v18, %v892_v21  ;;  %v1164_v21 = vld [vmem:[#allocation7 + $0x20] sm:$0xff] }
 0xcbe   :  { %v897_v19 = vpop.permute.xlu0 %896 }
 0xcbf   :  { %v899_v20 = vmul.f32 %v2522_v18, %v897_v19 }
 0xcc1   :  { %901 = vrot.lane.b32.xlu0 %v899_v20, %s2688_s6  ;;  %v1165_v20 = vld [vmem:[#allocation7 + $0x28] sm:$0xff] }
 0xd33   :  { %v902_v41 = vpop.permute.xlu0 %901 }
 0xd34   :  { %v904_v42 = vadd.f32 %v902_v41, %v894_v22  ;;  %v1163_v22 = vld [vmem:[#allocation7 + $0x18] sm:$0xff]  ;;  %v1162_v41 = vld [vmem:[#allocation7 + $0x10] sm:$0xff] }
 0xd36   :  { %2523 = vtanh.f32 %v904_v42  ;;  %912 = vrot.lane.b32.xlu0 %v904_v42, %s2688_s6  ;;  %v1259_v42 = vld [vmem:[%s3289_s9 + $0x8] sm:$0xff] }
 0xd37   :  { %2525 = vpow2.f32 %v2241_v44  ;;  %2384 = vmatprep.subr.mxu0 %v1259_v42  ;;  %v1161_v44 = vld [vmem:[#allocation7 + $0x8] sm:$0xff] }
 0xd43   :  { %v2524_v43 = vpop.eup %2523 }
 0xd44   :  { %907 = vrot.lane.b32.xlu1 %v2524_v43, %s2688_s6  ;;  %v2526_v5 = vpop.eup %2525  ;;  %v1258_v43 = vld [vmem:[%s3289_s9] sm:$0xff] }
 0xd45   :  { %v884_v45 = vadd.f32 1.0, %v2526_v5  ;;  %v1160_v5 = vld [vmem:[#allocation7] sm:$0xff] }
 0xd47   :  { %2527 = vrcp.f32 %v884_v45 }
 0xd54   :  { %v2528_v47 = vpop.eup %2527 }
 0xda8   :  { %v913_v46 = vpop.permute.xlu0 %912 }
 0xda9   :  { %v915_v38 = vsel %vm876_vm9, %v913_v46, %v791_v33 }
 0xdaa   :  { %1013 = vrot.lane.b32.xlu0 %v915_v38, %s2688_s6 }
 0xdb6   :  { %v908_v48 = vpop.permute.xlu1 %907 }
 0xdb7   :  { %v910_v49 = vmul.f32 %v2528_v47, %v908_v48  ;;  %v1119_v47 = vld [vmem:[%s3280_s0 + $0xe] sm:$0x3] }
 0xdb8   :  { %vm1120_vm11 = vcmp.gt.f32.partialorder %v1119_v47, 0.0 }
 0xdb9   :  { %v916_v50 = vsel %vm876_vm9, %v910_v49, %v792_v40  ;;  %vm2161_vm9 = vcmask 33792  }
 0xdba   :  { %917 = vst.msk [vmem:[#allocation3 + $0xa] sm:$0x3] %vm305_vm2, %v916_v50  ;;  %2242 = vmatmul.mubr.msk.f32.vlgmr.msra.gmra.mxu1 %vm192_vm4, %v916_v50 }
 0xdbb   :  { %918 = vst.msk [vmem:[#allocation3 + $0x4] sm:$0x3] %vm307_vm3, %v916_v50  ;;  %2366 = vmatpush3.msra.mxu1 %v1167_v36 }
 0xdbc   :  { %2367 = vmatprep.subr.mxu1 %v1166_v16 }
 0xdbd   :  { %2368 = vmatpush3.msra.mxu1 %v1166_v16 }
 0xdbe   :  { %2369 = vmatprep.subr.mxu1 %v1165_v20 }
 0xdbf   :  { %2370 = vmatpush3.msra.mxu1 %v1165_v20 }
 0xdc0   :  { %2371 = vmatprep.subr.mxu1 %v1164_v21 }
 0xdc1   :  { %2372 = vmatpush3.msra.mxu1 %v1164_v21 }
 0xdc2   :  { %2373 = vmatprep.subr.mxu1 %v1163_v22 }
 0xdc3   :  { %2374 = vmatpush3.msra.mxu1 %v1163_v22 }
 0xdc4   :  { %2375 = vmatprep.subr.mxu1 %v1162_v41 }
 0xdc5   :  { %2376 = vmatpush3.msra.mxu1 %v1162_v41 }
 0xdc6   :  { %2377 = vmatprep.subr.mxu1 %v1161_v44 }
 0xdc7   :  { %2378 = vmatpush3.msra.mxu1 %v1161_v44 }
 0xdc8   :  { %2379 = vmatprep.subr.mxu1 %v1160_v5 }
 0xdc9   :  { %2380 = vmatpush3.msra.mxu1 %v1160_v5 }
 0xe1c   :  { %v1014_v1 = vpop.permute.xlu0 %1013 }
 0xe7a   :  { %v992_v51 = vpop.f32.mrf.mxu1 }
 0xe7b   :  { %v993_v57 = vadd.f32 %v992_v51, %v919_v56 }
 0xe7c   :  { %v994_v53 = vpop.f32.mrf.mxu1 }
 0xe7d   :  { %v995_v54 = vadd.f32 %v994_v53, %v920_v52  ;;  %v2243_v58 = vmul.f32 -1.442695, %v993_v57 }
 0xe7f   :  { %2529 = vtanh.f32 %v995_v54  ;;  %v2244_v11 = vmul.f32 -1.442695, %v995_v54  ;;  %v2248_v54 = vld [vmem:[%s3288_s8] ss:$0 sm:$0xff] }
 0xe80   :  { %2531 = vpow2.f32 %v2243_v58 }
 0xe8c   :  { %v2530_v55 = vpop.eup %2529 }
 0xe8d   :  { %1018 = vrot.lane.b32.xlu1 %v2530_v55, %s2688_s6  ;;  %v2532_v59 = vpop.eup %2531 }
 0xe8e   :  { %v1005_v60 = vadd.f32 1.0, %v2532_v59 }
 0xe90   :  { %2533 = vrcp.f32 %v1005_v60  ;;  %v1341_v60 = vld [vmem:[%s3282_s2] sm:$0xff] }
 0xe9d   :  { %v2534_v61 = vpop.eup %2533 }
 0xe9e   :  { %v1016_v2 = vmul.f32 %v2534_v61, %v1014_v1  ;;  %v2689_v1 = vmov 1  }
 0xe9f   :  { %2445 = vset.pattern.permute.xlu1 %v2689_v1 }
 0xeff   :  { %v1019_v62 = vpop.permute.xlu1 %1018 }
 0xf00   :  { %v1021_v63 = vmul.f32 %v2534_v61, %v1019_v62  ;;  %v1342_v62 = vld [vmem:[%s3282_s2 + $0x8] sm:$0xff] }
 0xf02   :  { %1023 = vrot.lane.b32.xlu1 %v1021_v63, %s2688_s6  ;;  %v1499_v63 = vld [vmem:[%s3281_s1] sm:$0xff] }
 0xf03   :  { %vm1533_vm12 = vcmp.gt.f32.partialorder %v1499_v63, 0.0  ;;  %v1530_v63 = vld [vmem:[%s3290_s10 + $0xf0] sm:$0xff] }
 0xf74   :  { %v1024_v3 = vpop.permute.xlu1 %1023 }
 0xf75   :  { %v1026_v4 = vadd.f32 %v1024_v3, %v1016_v2  ;;  %v2690_v2 = vmov 0  }
 0xf76   :  { %2444 = vset.pattern.permute.xlu0 %v2690_v2  ;;  %v1534_v3 = vsel %vm1533_vm12, 1, %v2690_v2  ;;  %v1529_v2 = vld [vmem:[%s3290_s10 + $0xe8] sm:$0xff] }
 0xf77   :  { %2535 = vtanh.f32 %v1026_v4  ;;  %1034 = vrot.lane.b32.xlu1 %v1026_v4, %s2688_s6 }
 0xf78   :  { %2537 = vpow2.f32 %v2244_v11 }
 0xf84   :  { %v2536_v6 = vpop.eup %2535 }
 0xf85   :  { %1029 = vrot.lane.b32.xlu0 %v2536_v6, %s2688_s6  ;;  %v2538_v23 = vpop.eup %2537 }
 0xf86   :  { %v1006_v25 = vadd.f32 1.0, %v2538_v23 }
 0xf88   :  { %2539 = vrcp.f32 %v1006_v25 }
 0xf95   :  { %v2540_v28 = vpop.eup %2539 }
 0xfe9   :  { %v1035_v26 = vpop.permute.xlu1 %1034 }
 0xfea   :  { %v1037_v27 = vsel %vm998_vm10, %v1035_v26, %v915_v38 }
 0xfeb   :  { %1135 = vrot.lane.b32.xlu1 %v1037_v27, %s2688_s6 }
 0xff7   :  { %v1030_v30 = vpop.permute.xlu0 %1029 }
 0xff8   :  { %v1032_v31 = vmul.f32 %v2540_v28, %v1030_v30 }
 0xffa   :  { %v3073_v32 = vsel %vm998_vm10, %v1032_v31, %v916_v50  ;;  %vm2176_vm10 = vcmask 0  }
 0xffb   :  { %1039 = vst.msk [vmem:[#allocation3 + $0xc] sm:$0x3] %vm305_vm2, %v3073_v32  ;;  %2245 = vmatmul.mubr.msk.f32.vlgmr.msra.gmra.mxu0 %vm192_vm4, %v3073_v32 }
 0xffc   :  { %1040 = vst.msk [vmem:[#allocation3 + $0x2] sm:$0x3] %vm307_vm3, %v3073_v32  ;;  %2385 = vmatpush3.msra.mxu0 %v1259_v42 }
 0xffd   :  { %2386 = vmatprep.subr.mxu0 %v1258_v43 }
 0xffe   :  { %2387 = vmatpush3.msra.mxu0 %v1258_v43 }
0x105d   :  { %v1136_v17 = vpop.permute.xlu1 %1135 }
0x10bb   :  { %v1114_v33 = vpop.f32.mrf.mxu0 }
0x10bc   :  { %v1115_v8 = vadd.f32 %v1114_v33, %v1041_v7 }
0x10bd   :  { %v1116_v37 = vpop.f32.mrf.mxu0 }
0x10be   :  { %v1117_v39 = vadd.f32 %v1116_v37, %v1042_v35  ;;  %v2246_v9 = vmul.f32 -1.442695, %v1115_v8 }
0x10c0   :  { %2541 = vtanh.f32 %v1117_v39  ;;  %v2247_v45 = vmul.f32 -1.442695, %v1117_v39 }
0x10c1   :  { %2543 = vpow2.f32 %v2246_v9 }
0x10cd   :  { %v2542_v40 = vpop.eup %2541 }
0x10ce   :  { %1140 = vrot.lane.b32.xlu0 %v2542_v40, %s2688_s6  ;;  %v2544_v10 = vpop.eup %2543 }
0x10cf   :  { %v1127_v12 = vadd.f32 1.0, %v2544_v10 }
0x10d1   :  { %2545 = vrcp.f32 %v1127_v12 }
0x10de   :  { %v2546_v13 = vpop.eup %2545 }
0x10df   :  { %v1138_v18 = vmul.f32 %v2546_v13, %v1136_v17 }
0x1140   :  { %v1141_v14 = vpop.permute.xlu0 %1140 }
0x1141   :  { %v1143_v15 = vmul.f32 %v2546_v13, %v1141_v14 }
0x1143   :  { %1145 = vrot.lane.b32.xlu0 %v1143_v15, %s2688_s6 }
0x1147   :  { %1536 = vperm.xlu0 %2444, %v1534_v3  }
0x11b5   :  { %v1146_v34 = vpop.permute.xlu0 %1145 }
0x11b6   :  { %v1148_v19 = vadd.f32 %v1146_v34, %v1138_v18 }
0x11b8   :  { %2547 = vtanh.f32 %v1148_v19 }
0x11b9   :  { %2549 = vpow2.f32 %v2247_v45 }
0x11c2   :  { %v1537_v25 = vpop.permute.xlu0 %1536 }
0x11c3   :  { %vm1538_vm1 = vcmp.eq.s32.totalorder %v1537_v25, 1  ;;  %v1510_v25 = vld [vmem:[%s3290_s10 + $0x50] sm:$0xff] }
0x11c5   :  { %v2548_v29 = vpop.eup %2547 }
0x11c6   :  { %1151 = vrot.lane.b32.xlu1 %v2548_v29, %s2688_s6  ;;  %v2550_v46 = vpop.eup %2549 }
0x11c7   :  { %v1128_v38 = vadd.f32 1.0, %v2550_v46 }
0x11c9   :  { %2551 = vrcp.f32 %v1128_v38 }
0x11ca   :  { %1848 = vperm.xlu1 %2445, %v1534_v3   ;;  %v1513_v3 = vld [vmem:[%s3290_s10 + $0x68] sm:$0xff] }
0x11d6   :  { %v2552_v48 = vpop.eup %2551 }
0x1238   :  { %v1152_v49 = vpop.permute.xlu1 %1151 }
0x1239   :  { %v1154_v50 = vmul.f32 %v2552_v48, %v1152_v49 }
0x123b   :  { %v1155_v51 = vsel %vm1120_vm11, %v1154_v50, %v3073_v32 }
0x123c   :  { %1156 = vst.msk [vmem:[#allocation3 + $0xe] sm:$0x3] %vm305_vm2, %v1155_v51  ;;  %vm1593_vm2 = vcmask 60416  }
0x123d   :  { %1157 = vst.msk [vmem:[#allocation3] sm:$0x3] %vm307_vm3, %v1155_v51 }
0x1243   :  { %v1159_v53 = vld [vmem:[#allocation3 + $0x8] sm:$0xff] }
0x1244   :  { %v1158_v52 = vld [vmem:[#allocation3] sm:$0xff]  ;;  %2391 = vmatprep.subr.mxu0 %v1159_v53 }
0x1245   :  { %2381 = vmatprep.mubr.msk.f32.mxu1 %vm192_vm4, %v1158_v52  ;;  %v1849_v24 = vpop.permute.xlu1 %1848 }
0x1246   :  { %2382 = vmatmul.mubr.msk.f32.vlgmr.msra.gmra.mxu1 %vm192_vm4, %v1159_v53  ;;  %vm1850_vm14 = vcmp.eq.s32.totalorder %v1849_v24, 1  ;;  %v1526_v24 = vld [vmem:[%s3290_s10 + $0xd0] sm:$0xff] }
0x1306   :  { %v2383_v55 = vpop.f32.mrf.mxu1 }
0x1307   :  { %v1253_v56 = vadd.f32 %v2383_v55, %v2248_v54 }
0x1308   :  { %v1247_v57 = vpop.f32.mrf.mxu1 }
0x1309   :  { %v1248_v58 = vadd.f32 %v2248_v54, %v1247_v57 }
0x130b   :  { %2553 = vtanh.f32 %v1248_v58 }
0x130c   :  { %2555 = vtanh.f32 %v1253_v56 }
0x1318   :  { %v2554_v59 = vpop.eup %2553 }
0x1319   :  { %v2556_v61 = vpop.eup %2555  ;;  %2388 = vmatprep.mubr.msk.f32.mxu0 %vm108_vm0, %v2554_v59 }
0x131a   :  { %2389 = vmatmul.mubr.msk.f32.vlgmr.msra.gmra.mxu0 %vm108_vm0, %v2556_v61  ;;  %v1531_v61 = vld [vmem:[%s3290_s10 + $0xf8] sm:$0xff] }
0x131b   :  { %2392 = vmatpush3.msra.mxu0 %v1159_v53  ;;  %2395 = vmatprep.mubr.msk.f32.mxu0 %vm108_vm0, %v1341_v60 }
0x131c   :  { %2393 = vmatprep.subr.mxu0 %v1158_v52  ;;  %2289 = vmatprep.subr.mxu1 %v1531_v61 }
0x131d   :  { %2394 = vmatpush3.msra.mxu0 %v1158_v52 }
0x131e   :  { %2396 = vmatmul.mubr.msk.f32.vlgmr.msra.gmra.mxu0 %vm108_vm0, %v1342_v62 }
0x131f   :  { %2402 = vmatprep.mubr.msk.f32.mxu0 %vm108_vm0, %v1341_v60 }
0x13da   :  { %v2390_v4 = vpop.f32.mrf.mxu0 }
0x13db   :  { %2398 = vmatprep.subr.mxu0 %v2390_v4 }
0x13dc   :  { %v1332_v6 = vpop.f32.mrf.mxu0  ;;  %2399 = vmatpush3.msra.mxu0 %v2390_v4  ;;  %v1528_v4 = vld [vmem:[%s3290_s10 + $0xe0] sm:$0xff] }
0x13dd   :  { %2400 = vmatprep.subr.mxu0 %v1332_v6 }
0x13de   :  { %2401 = vmatpush3.msra.mxu0 %v1332_v6  ;;  %v3118_v11 = vpop.f32.mrf.mxu0  ;;  %v1512_v6 = vld [vmem:[%s3290_s10 + $0x60] sm:$0xff] }
0x13df   :  { %2403 = vmatmul.mubr.msk.f32.vlgmr.msra.gmra.mxu0 %vm108_vm0, %v1342_v62  ;;  %2405 = vmatprep.subr.mxu0 %v2687_v0  ;;  %vm1595_vm0 = vcmask 64512   ;;  %v1515_v62 = vld [vmem:[%s3290_s10 + $0x78] sm:$0xff] }
0x13e0   :  { %v1415_v23 = vpop.f32.mrf.mxu0  ;;  %2407 = vmatprep.mubr.msk.f32.mxu0 %vm2691_vm13, %v2687_v0  ;;  %2290 = vmatpush3.msra.mxu1 %v1515_v62 }
0x13e1   :  { %2406 = vmatpush3.msra.mxu0 %v1415_v23  ;;  %2291 = vmatprep.subr.mxu1 %v1530_v63  ;;  %v1511_v23 = vld [vmem:[%s3290_s10 + $0x58] sm:$0xff] }
0x13e2   :  { %2410 = vmatprep.subr.mxu0 %v2687_v0 }
0x149f   :  { %v2404_v26 = vpop.f32.mrf.mxu0 }
0x14a0   :  { %v1851_v27 = vsel %vm1850_vm14, %v2404_v26, -1e+30  ;;  %v1525_v26 = vld [vmem:[%s3290_s10 + $0xc8] sm:$0xff] }
0x14a1   :  { %v1852_v28 = vsel %vm1540_vm15, %v1851_v27, -inf  ;;  %v1490_v30 = vpop.f32.mrf.mxu0 }
0x14a2   :  { %v1853_v31 = vrot.slane %v1852_v28, 4  ;;  %v1539_v32 = vsel %vm1538_vm1, %v1490_v30, -1e+30  ;;  %v1508_v30 = vld [vmem:[%s3290_s10 + $0x40] sm:$0xff] }
0x14a3   :  { %v1541_v33 = vsel %vm1540_vm15, %v1539_v32, -inf }
0x14a4   :  { %v1854_v35 = vmax.f32 %v1852_v28, %v1853_v31  ;;  %v1542_v37 = vrot.slane %v1541_v33, 4  ;;  %v1524_v28 = vld [vmem:[%s3290_s10 + $0xc0] sm:$0xff]  ;;  %v1523_v31 = vld [vmem:[%s3290_s10 + $0xb8] sm:$0xff] }
0x14a6   :  { %v1855_v39 = vrot.slane %v1854_v35, 2  ;;  %v1543_v40 = vmax.f32 %v1541_v33, %v1542_v37  ;;  %v1522_v33 = vld [vmem:[%s3290_s10 + $0xb0] sm:$0xff]  ;;  %v1521_v37 = vld [vmem:[%s3290_s10 + $0xa8] sm:$0xff] }
0x14a8   :  { %v1856_v7 = vmax.f32 %v1854_v35, %v1855_v39  ;;  %v1544_v8 = vrot.slane %v1543_v40, 2  ;;  %v1506_v35 = vld [vmem:[%s3290_s10 + $0x30] sm:$0xff]  ;;  %v1505_v39 = vld [vmem:[%s3290_s10 + $0x28] sm:$0xff] }
0x14aa   :  { %v1857_v9 = vrot.slane %v1856_v7, 1  ;;  %v1545_v10 = vmax.f32 %v1543_v40, %v1544_v8  ;;  %v1520_v40 = vld [vmem:[%s3290_s10 + $0xa0] sm:$0xff]  ;;  %v1519_v8 = vld [vmem:[%s3290_s10 + $0x98] sm:$0xff] }
0x14ac   :  { %v1858_v12 = vmax.f32 %v1856_v7, %v1857_v9  ;;  %v1546_v13 = vrot.slane %v1545_v10, 1  ;;  %v1504_v7 = vld [vmem:[%s3290_s10 + $0x20] sm:$0xff]  ;;  %v1503_v9 = vld [vmem:[%s3290_s10 + $0x18] sm:$0xff] }
0x14ae   :  { %v1859_v14 = vsub.f32 %v1851_v27, %v1858_v12  ;;  %v1547_v15 = vmax.f32 %v1545_v10, %v1546_v13  ;;  %v1509_v27 = vld [vmem:[%s3290_s10 + $0x48] sm:$0xff]  ;;  %v1518_v10 = vld [vmem:[%s3290_s10 + $0x90] sm:$0xff] }
0x14af   :  { %v1502_v12 = vld [vmem:[%s3290_s10 + $0x10] sm:$0xff]  ;;  %v1517_v13 = vld [vmem:[%s3290_s10 + $0x88] sm:$0xff] }
0x14b0   :  { %v1860_v36 = vmul.f32 1.442695, %v1859_v14  ;;  %v1548_v16 = vsub.f32 %v1539_v32, %v1547_v15  ;;  %v1507_v32 = vld [vmem:[%s3290_s10 + $0x38] sm:$0xff]  ;;  %v1501_v14 = vld [vmem:[%s3290_s10 + $0x8] sm:$0xff]  ;;  %v1516_v15 = vld [vmem:[%s3290_s10 + $0x80] sm:$0xff] }
0x14b2   :  { %2557 = vpow2.f32 %v1860_v36  ;;  %v1549_v17 = vmul.f32 1.442695, %v1548_v16  ;;  %v1500_v36 = vld [vmem:[%s3290_s10] sm:$0xff] }
0x14b4   :  { %2559 = vpow2.f32 %v1549_v17 }
0x14bf   :  { %v2558_v18 = vpop.eup %2557 }
0x14c0   :  { %v1862_v34 = vsel %vm1540_vm15, %v2558_v18, 0.0 }
0x14c1   :  { %v2560_v19 = vpop.eup %2559  ;;  %v1863_v20 = vrot.slane %v1862_v34, 4 }
0x14c2   :  { %v1551_v21 = vsel %vm1540_vm15, %v2560_v19, 0.0 }
0x14c3   :  { %v1864_v22 = vadd.f32 %v1863_v20, %v1862_v34  ;;  %v1552_v41 = vrot.slane %v1551_v21, 4 }
0x14c5   :  { %v1865_v42 = vrot.slane %v1864_v22, 2  ;;  %v1553_v43 = vadd.f32 %v1552_v41, %v1551_v21 }
0x14c7   :  { %v1866_v44 = vadd.f32 %v1865_v42, %v1864_v22  ;;  %v1554_v5 = vrot.slane %v1553_v43, 2 }
0x14c9   :  { %v1867_v29 = vrot.slane %v1866_v44, 1  ;;  %v1555_v45 = vadd.f32 %v1554_v5, %v1553_v43 }
0x14cb   :  { %v1868_v46 = vadd.f32 %v1867_v29, %v1866_v44  ;;  %v1556_v38 = vrot.slane %v1555_v45, 1 }
0x14cd   :  { %2561 = vrcp.f32 %v1868_v46  ;;  %v1557_v47 = vadd.f32 %v1556_v38, %v1555_v45 }
0x14cf   :  { %2563 = vrcp.f32 %v1557_v47 }
0x14da   :  { %v2562_v48 = vpop.eup %2561 }
0x14db   :  { %v1870_v49 = vmul.f32 %v2562_v48, %v2558_v18 }
0x14dc   :  { %v2564_v50 = vpop.eup %2563 }
0x14dd   :  { %v1871_v51 = vsel %vm1850_vm14, %v1870_v49, 0.0  ;;  %v1559_v52 = vmul.f32 %v2564_v50, %v2560_v19 }
0x14de   :  { %1872 = vxpose.xlu0.b32.start.end [1/1] (short) (narrow) %v1871_v51, 8 }
0x14df   :  { %v1560_v53 = vsel %vm1538_vm1, %v1559_v52, 0.0 }
0x14e0   :  { %1561 = vxpose.xlu1.b32.start.end [1/1] (short) (narrow) %v1560_v53, 8 }
0x1507   :  { %2456 = vset.pattern.permute.xlu0 %v2689_v1  ;;  %v1514_v1 = vld [vmem:[%s3290_s10 + $0x70] sm:$0xff] }
0x1508   :  { %2292 = vmatpush3.msra.mxu1 %v1514_v1 }
0x1509   :  { %2293 = vmatprep.subr.mxu1 %v1529_v2 }
0x150a   :  { %2294 = vmatpush3.msra.mxu1 %v1513_v3 }
0x150b   :  { %2295 = vmatprep.subr.mxu1 %v1528_v4 }
0x150c   :  { %2296 = vmatpush3.msra.mxu1 %v1512_v6 }
0x155a   :  { %v3134_v54 = vpop.trf.xlu0 }
0x155b   :  { %1905 = vst.msk [vmem:[#allocation10 + $0x4] sm:$0xf] %vm1593_vm2, %v3134_v54  ;;  %vm2064_vm7 = vcmp.eq.f32.partialorder %v3134_v54, inf  ;;  %v2067_v51 = vand.u32 2147483648, %v3134_v54  ;;  %vm2066_vm8 = vcmp.eq.f32.partialorder %v3134_v54, 0.0 }
0x155c   :  { %v1577_v55 = vpop.trf.xlu1 }
0x155d   :  { %2565 = vrsqrt.f32 %v1577_v55  ;;  %2408 = vmatmul.mubr.msk.f32.vlgmr.msra.gmra.mxu0 %vm1595_vm0, %v1577_v55  ;;  %1594 = vst.msk [vmem:[#allocation10] sm:$0xf] %vm1593_vm2, %v1577_v55  ;;  %vm1754_vm3 = vcmp.eq.f32.partialorder %v1577_v55, inf  ;;  %v1757_v58 = vand.u32 2147483648, %v1577_v55  ;;  %vm1756_vm5 = vcmp.eq.f32.partialorder %v1577_v55, 0.0 }
0x155e   :  { %2412 = vmatprep.mubr.msk.f32.mxu0 %vm2691_vm13, %v2687_v0  ;;  %2567 = vrsqrt.f32 %v3134_v54 }
0x156a   :  { %v2566_v56 = vpop.eup %2565 }
0x156b   :  { %v1753_v57 = vmul.f32 %v2566_v56, %v1577_v55  ;;  %v2568_v46 = vpop.eup %2567 }
0x156c   :  { %v2063_v38 = vmul.f32 %v2568_v46, %v3134_v54 }
0x156d   :  { %v1755_v59 = vsel %vm1754_vm3, %v1577_v55, %v1753_v57 }
0x156e   :  { %v1758_v60 = vsel %vm1756_vm5, %v1757_v58, %v1755_v59  ;;  %v2065_v52 = vsel %vm2064_vm7, %v3134_v54, %v2063_v38 }
0x156f   :  { %2411 = vmatpush3.xpose.msk.msra.mxu0 %vm1595_vm0, %v1758_v60  ;;  %v2068_v56 = vsel %vm2066_vm8, %v2067_v51, %v2065_v52 }
0x1570   :  { %2415 = vmatprep.subr.mxu0 %v2687_v0 }
0x1572   :  { %2413 = vmatmul.mubr.msk.f32.vlgmr.msra.gmra.mxu0 %vm1595_vm0, %v1758_v60 }
0x1573   :  { %2416 = vmatpush3.msra.mxu0 %v3118_v11  ;;  %2417 = vmatprep.mubr.msk.f32.mxu0 %vm2691_vm13, %v2687_v0  ;;  %v1527_v11 = vld [vmem:[%s3290_s10 + $0xd8] sm:$0xff] }
0x1574   :  { %2328 = vmatprep.subr.mxu0 %v1531_v61  ;;  %2297 = vmatprep.subr.mxu1 %v1527_v11 }
0x1575   :  { %2298 = vmatpush3.msra.mxu1 %v1511_v23 }
0x1576   :  { %2418 = vmatmul.mubr.msk.f32.vlgmr.msra.gmra.mxu0 %vm1595_vm0, %v3134_v54  ;;  %2299 = vmatprep.subr.mxu1 %v1526_v24 }
0x1577   :  { %2329 = vmatpush3.msra.mxu0 %v1515_v62  ;;  %2300 = vmatpush3.msra.mxu1 %v1510_v25 }
0x1578   :  { %2330 = vmatprep.subr.mxu0 %v1530_v63  ;;  %2301 = vmatprep.subr.mxu1 %v1525_v26 }
0x1579   :  { %2331 = vmatpush3.msra.mxu0 %v1514_v1  ;;  %2302 = vmatpush3.msra.mxu1 %v1509_v27 }
0x157a   :  { %2332 = vmatprep.subr.mxu0 %v1529_v2  ;;  %2303 = vmatprep.subr.mxu1 %v1524_v28 }
0x157b   :  { %2333 = vmatpush3.msra.mxu0 %v1513_v3  ;;  %2304 = vmatpush3.msra.mxu1 %v1508_v30 }
0x157c   :  { %2334 = vmatprep.subr.mxu0 %v1528_v4  ;;  %2305 = vmatprep.subr.mxu1 %v1523_v31 }
0x157d   :  { %2335 = vmatpush3.msra.mxu0 %v1512_v6  ;;  %2306 = vmatpush3.msra.mxu1 %v1507_v32 }
0x157e   :  { %2336 = vmatprep.subr.mxu0 %v1527_v11  ;;  %2307 = vmatprep.subr.mxu1 %v1522_v33 }
0x157f   :  { %2337 = vmatpush3.msra.mxu0 %v1511_v23  ;;  %2308 = vmatpush3.msra.mxu1 %v1506_v35 }
0x1580   :  { %2338 = vmatprep.subr.mxu0 %v1526_v24  ;;  %2309 = vmatprep.subr.mxu1 %v1521_v37 }
0x1581   :  { %2339 = vmatpush3.msra.mxu0 %v1510_v25  ;;  %2310 = vmatpush3.msra.mxu1 %v1505_v39 }
0x1582   :  { %2340 = vmatprep.subr.mxu0 %v1525_v26  ;;  %2311 = vmatprep.subr.mxu1 %v1520_v40 }
0x1583   :  { %2341 = vmatpush3.msra.mxu0 %v1509_v27  ;;  %2312 = vmatpush3.msra.mxu1 %v1504_v7 }
0x1584   :  { %2342 = vmatprep.subr.mxu0 %v1524_v28  ;;  %2313 = vmatprep.subr.mxu1 %v1519_v8 }
0x1585   :  { %2343 = vmatpush3.msra.mxu0 %v1508_v30  ;;  %2314 = vmatpush3.msra.mxu1 %v1503_v9 }
0x1586   :  { %2344 = vmatprep.subr.mxu0 %v1523_v31  ;;  %2315 = vmatprep.subr.mxu1 %v1518_v10 }
0x1587   :  { %2345 = vmatpush3.msra.mxu0 %v1507_v32  ;;  %2316 = vmatpush3.msra.mxu1 %v1502_v12 }
0x1588   :  { %2346 = vmatprep.subr.mxu0 %v1522_v33  ;;  %2317 = vmatprep.subr.mxu1 %v1517_v13  ;;  %v1532_v33 = vld [vmem:[%s3291_s11] sm:$0x1] }
0x1589   :  { %2347 = vmatpush3.msra.mxu0 %v1506_v35  ;;  %2318 = vmatpush3.msra.mxu1 %v1501_v14 }
0x158a   :  { %2348 = vmatprep.subr.mxu0 %v1521_v37  ;;  %2319 = vmatprep.subr.mxu1 %v1516_v15 }
0x158b   :  { %2349 = vmatpush3.msra.mxu0 %v1505_v39  ;;  %2320 = vmatpush3.msra.mxu1 %v1500_v36 }
0x158c   :  { %2350 = vmatprep.subr.mxu0 %v1520_v40  ;;  %2420 = vmatprep.subr.mxu1 %v2687_v0 }
0x158d   :  { %2351 = vmatpush3.msra.mxu0 %v1504_v7 }
0x158e   :  { %2352 = vmatprep.subr.mxu0 %v1519_v8 }
0x158f   :  { %2353 = vmatpush3.msra.mxu0 %v1503_v9 }
0x1590   :  { %2354 = vmatprep.subr.mxu0 %v1518_v10 }
0x1591   :  { %2355 = vmatpush3.msra.mxu0 %v1502_v12 }
0x1592   :  { %2356 = vmatprep.subr.mxu0 %v1517_v13 }
0x1593   :  { %2357 = vmatpush3.msra.mxu0 %v1501_v14 }
0x1594   :  { %2358 = vmatprep.subr.mxu0 %v1516_v15 }
0x1595   :  { %2359 = vmatpush3.msra.mxu0 %v1500_v36 }
0x161d   :  { %v1665_v16 = vpop.f32.mrf.mxu0 }
0x161e   :  { %v1670_v17 = vrot.slane %v1665_v16, 1  ;;  %v1676_v18 = vrot.slane %v1665_v16, 3  ;;  %v1674_v48 = vrot.slane %v1665_v16, 2 }
0x161f   :  { %v2409_v34 = vpop.f32.mrf.mxu0 }
0x1620   :  { %v2451_v19 = vpack.i.bf16 %v1670_v17, %v1676_v18 }
0x1622   :  { %2452 = vrot.lane.b32.xlu1 %v2451_v19, %s2688_s6 }
0x1632   :  { %v1828_v20 = vpop.f32.mrf.mxu0 }
0x1633   :  { %v2260_v5 = vadd.f32 -1.0, %v1828_v20 }
0x1634   :  { %v2414_v21 = vpop.f32.mrf.mxu0 }
0x1635   :  { %v1833_v29 = vmul.f32 %v2260_v5, %v2260_v5 }
0x1636   :  { %v1975_v22 = vpop.f32.mrf.mxu0 }
0x1637   :  { %v1980_v41 = vrot.slane %v1975_v22, 1  ;;  %v1986_v42 = vrot.slane %v1975_v22, 3  ;;  %v1835_v45 = vsel %vm1834_vm6, %v1833_v29, 0.0  ;;  %v1984_v58 = vrot.slane %v1975_v22, 2 }
0x1638   :  { %v2419_v43 = vpop.f32.mrf.mxu0 }
0x1639   :  { %v2446_v44 = vpack.i.bf16 %v1980_v41, %v1986_v42 }
0x163b   :  { %2447 = vrot.lane.b32.xlu0 %v2446_v44, %s2688_s6 }
0x165a   :  { %1836 = vadd.xlane.f32.xlu0 %v1835_v45 }
0x1694   :  { %v2453_v47 = vpop.permute.xlu1 %2452 }
0x1695   :  { %v2455_v49 = vunpack.i.h.bf16 %v2453_v47  ;;  %v2454_v50 = vunpack.i.l.bf16 %v2453_v47 }
0x1697   :  { %v1681_v53 = vsel %vm192_vm4, %v1674_v48, %v2454_v50  ;;  %v1680_v55 = vsel %vm192_vm4, %v1665_v16, %v2455_v49 }
0x1698   :  { %1746 = vmatprep.mubr.f32.mxu1 %v1681_v53 }
0x1699   :  { %1747 = vmatmul.mubr.f32.vlgmr.msra.gmra.mxu1 %v1680_v55 }
0x169a   :  { %2421 = vmatpush3.xpose.msk.msra.mxu1 %vm1595_vm0, %v2068_v56  ;;  %2422 = vmatprep.mubr.msk.f32.mxu1 %vm2691_vm13, %v2687_v0 }
0x169d   :  { %2423 = vmatmul.mubr.msk.f32.vlgmr.msra.gmra.mxu1 %vm1595_vm0, %v2068_v56 }
0x16ad   :  { %v2448_v57 = vpop.permute.xlu0 %2447 }
0x16ae   :  { %v2450_v59 = vunpack.i.h.bf16 %v2448_v57  ;;  %v2449_v60 = vunpack.i.l.bf16 %v2448_v57 }
0x16b0   :  { %v1991_v54 = vsel %vm192_vm4, %v1984_v58, %v2449_v60  ;;  %v1990_v61 = vsel %vm192_vm4, %v1975_v22, %v2450_v59  ;;  %vm2159_vm4 = vcmask 1040384  }
0x16b1   :  { %2056 = vmatprep.mubr.f32.mxu0 %v1991_v54 }
0x16b2   :  { %2057 = vmatmul.mubr.f32.vlgmr.msra.gmra.mxu0 %v1990_v61 }
0x16e3   :  { %v1837_v62 = vpop.xlane.xlu0 %1836 }
0x16e4   :  { %v1838_v63 = vrot.slane %v1837_v62, 4 }
0x16e6   :  { %v1839_v1 = vadd.f32 %v1838_v63, %v1837_v62 }
0x16e8   :  { %v1840_v2 = vrot.slane %v1839_v1, 2 }
0x16ea   :  { %v1841_v3 = vadd.f32 %v1840_v2, %v1839_v1 }
0x16ec   :  { %v1842_v4 = vrot.slane %v1841_v3, 1 }
0x16ee   :  { %v1843_v6 = vadd.f32 %v1842_v4, %v1841_v3 }
0x16f0   :  { %2425 = vpush %v1843_v6 }
0x1721   :  { %s2426_s11 = spop %2425 }
0x1722   :  { %v1845_v19 = vstv %s2426_s11 }
0x1759   :  { %v2321_v0 = vpop.f32.mrf.mxu1 }
0x175b   :  { %v2322_v11 = vpop.f32.mrf.mxu1 }
0x175c   :  { %v2323_v31 = vadd.f32 %v2322_v11, %v2321_v0 }
0x175d   :  { %v2138_v23 = vpop.f32.mrf.mxu1 }
0x175e   :  { %v2264_v24 = vadd.f32 -1.0, %v2138_v23  ;;  %v1749_v37 = vadd.f32 %v2323_v31, %v1532_v33 }
0x175f   :  { %v2424_v25 = vpop.f32.mrf.mxu1 }
0x1760   :  { %v2143_v26 = vmul.f32 %v2264_v24, %v2264_v24 }
0x1762   :  { %v2144_v27 = vsel %vm1834_vm6, %v2143_v26, 0.0 }
0x1763   :  { %2145 = vadd.xlane.f32.xlu0 %v2144_v27 }
0x1772   :  { %v2360_v28 = vpop.f32.mrf.mxu0 }
0x1774   :  { %v2361_v30 = vpop.f32.mrf.mxu0 }
0x1775   :  { %v2362_v32 = vadd.f32 %v2361_v30, %v2360_v28 }
0x1777   :  { %v2059_v35 = vadd.f32 %v2362_v32, %v1532_v33 }
0x1779   :  { %v2157_v39 = vrot.slane %v2059_v35, 7 }
0x177b   :  { %v2160_v40 = vsel %vm2159_vm4, %v1749_v37, %v2157_v39 }
0x177c   :  { %v2162_v7 = vsel %vm2161_vm9, %v2160_v40, -inf }
0x177d   :  { %2163 = vmax.xlane.f32.xlu1 %v2162_v7 }
0x17ec   :  { %v2146_v8 = vpop.xlane.xlu0 %2145 }
0x17ed   :  { %v2147_v9 = vrot.slane %v2146_v8, 4 }
0x17ef   :  { %v2148_v10 = vadd.f32 %v2147_v9, %v2146_v8 }
0x17f1   :  { %v2149_v12 = vrot.slane %v2148_v10, 2 }
0x17f3   :  { %v2150_v13 = vadd.f32 %v2149_v12, %v2148_v10 }
0x17f5   :  { %v2151_v14 = vrot.slane %v2150_v13, 1 }
0x17f7   :  { %v2152_v15 = vadd.f32 %v2151_v14, %v2150_v13 }
0x17f9   :  { %2427 = vpush %v2152_v15 }
0x1806   :  { %v2164_v36 = vpop.xlane.xlu1 %2163 }
0x1807   :  { %v2165_v16 = vsub.f32 %v2160_v40, %v2164_v36 }
0x1809   :  { %v2166_v17 = vmul.f32 1.442695, %v2165_v16 }
0x180b   :  { %2569 = vpow2.f32 %v2166_v17 }
0x1818   :  { %v2570_v18 = vpop.eup %2569 }
0x1819   :  { %v2168_v34 = vsel %vm2161_vm9, %v2570_v18, 0.0 }
0x181a   :  { %2169 = vadd.xlane.f32.xlu1 %v2168_v34 }
0x182a   :  { %s2428_s9 = spop %2427 }
0x182b   :  { %v2154_v20 = vstv %s2428_s9 }
0x182c   :  { %v2155_v21 = vadd.f32 %v2154_v20, %v1845_v19 }
0x182e   :  { %2177 = vst.msk [vmem:[#allocation12] sm:$0x1] %vm2176_vm10, %v2155_v21 }
0x182f   :  { %2624 = shalt.err (!%p2621_p0)
}
0x1830   :  { %s2693_s0 = smov 4   ;;  %s2694_s23 = smov [#allocation12]  }
0x1831   :  { %2199 = dma.vmem_to_hbm [thread:$0]  %s2194_s20, 128, %s3293_s13, [#allocation11], %s2688_s6, %s2688_s6, %s2693_s0  }
0x1832   :  { %s2206_s24 = sshll.u32 %s2694_s23, 4  ;;  %s2207_s24 = int_to_ptr.vmem [resolvable:$true] %s2206_s24 }
0x1833   :  { %s2633_s25 = scalar_lea.vmem %s2207_s24, 16  ;;  %s2637_s1 = scalar_lea.vmem %s2207_s24, 32 }
0x1834   :  { %p2634_p1 = scmp.ne.s32.totalorder %s2207_s24, %s2633_s25  ;;  %p2638_p2 = scmp.lt.s32.totalorder %s2207_s24, %s2207_s24 }
0x1835   :  { %p2639_p3 = scmp.lt.s32.totalorder %s2637_s1, %s2633_s25 }
0x1837   :  { %p2640_p4 = por %p2639_p3, %p2638_p2 }
0x1839   :  { %p2641_p5 = pnand %p2640_p4, %p2634_p1 }
0x183b   :  { %2644 = shalt.err (!%p2641_p5)
}
0x183c   :  { %2209 = dma.vmem_to_hbm [thread:$0]  %s2207_s24, 16, %s3294_s14, [#allocation11]  }
0x183d   :  { %s2695_s13 = smov [#allocation9]  }
0x183e   :  { %s2184_s6 = sshll.u32 %s2695_s13, 4  ;;  %s2185_s6 = int_to_ptr.vmem [resolvable:$true] %s2184_s6 }
0x183f   :  { %s2653_s5 = scalar_lea.vmem %s2185_s6, 32  ;;  %p2658_p7 = scmp.lt.s32.totalorder %s2185_s6, %s2185_s6 }
0x1840   :  { %p2654_p6 = scmp.ne.s32.totalorder %s2185_s6, %s2653_s5  ;;  %p2659_p8 = scmp.lt.s32.totalorder %s2653_s5, %s2653_s5 }
0x1842   :  { %p2660_p9 = por %p2659_p8, %p2658_p7 }
0x1844   :  { %p2661_p10 = pnand %p2660_p9, %p2654_p6 }
0x18a3   :  { %v2170_v22 = vpop.xlane.xlu1 %2169 }
0x18a4   :  { %2571 = vlog2.f32 %v2170_v22 }
0x18b1   :  { %v2572_v41 = vpop.eup %2571 }
0x18b2   :  { %v2172_v42 = vmul.f32 0.6931472, %v2572_v41 }
0x18b4   :  { %v2173_v43 = vadd.f32 %v2172_v42, %v2164_v36 }
0x18b6   :  { %v2174_v44 = vsub.f32 %v2160_v40, %v2173_v43 }
0x18b8   :  { %2175 = vst.msk [vmem:[#allocation9] sm:$0x3] %vm2161_vm9, %v2174_v44 }
0x18b9   :  { %2664 = shalt.err (!%p2661_p10)
}
0x18ba   :  { %2187 = dma.vmem_to_hbm [thread:$0]  %s2185_s6, 32, %s3292_s12, [#allocation6]  }
0x18bb   :  { %2677 = dma.done.wait [#allocation6], 32  }
0x18bc   :  { %2678 = vsyncadd [#allocation6], 4294967264 }
0x18bd   :  { %2679 = dma.done.wait [#allocation11], 144  }
0x18be   :  { %2680 = vsyncadd [#allocation11], 4294967152 }
0x18bf   :  { %2219 = vsyncpa [#allocation5], 1 }
0x18c0   :  { %2220 = vsyncpa [#allocation8], 1 }
0x18c1   :  { %2221 = vsyncpa [#allocation6], 1 }
0x18c2   :  { %2222 = vsyncpa [#allocation11], 1 }

</bundles_post_ra>
